<compile_context>
chip_gen: v7x
topology: tpu7x:2x2x1
jax: 0.10.0
libtpu: 0.0.40
codegen_flags: <defaults>
</compile_context>

<pallas_src>
import functools
import math

import jax
import jax.numpy as jnp
from jax.experimental import pallas as pl
from jax.experimental.pallas import tpu as pltpu


# Raised above the default scoped VMEM limit (16 MiB v5e / 32 MiB v6e,v7x) but
# never above physical VMEM on any supported chip (64 MiB per TC on v7x).
_VMEM_LIMIT = 64 * 1024 * 1024


# ------------------------------ helpers -------------------------------------

def _pick_tile(m, cap=512):
    """Largest row tile (>=16) dividing m, capped.  Prefers 512/256 for the
    256x256 MXU on v6e/v7x; never falls back to 8-row tiles for bf16."""
    for t in (512, 256, 128, 64, 32, 16):
        if t <= cap and m % t == 0:
            return t
    return m


def _heads_per_group(n_heads, d_head):
    """Smallest head group whose merged output width hb*d_head is lane-dense
    (a multiple of 128); falls back to all heads (block == full dim)."""
    for hb in range(1, n_heads + 1):
        if n_heads % hb == 0 and (hb * d_head) % 128 == 0:
            return hb
    return n_heads


@functools.lru_cache(maxsize=None)
def _buffered_ok():
    """Probe once whether this build supports (and correctly handles)
    pipeline_mode=pl.Buffered(1) for grid-invariant input blocks."""
    try:
        def body(x_ref, o_ref):
            o_ref[...] = x_ref[...] + 1.0

        x = jnp.arange(8 * 128, dtype=jnp.float32).reshape(8, 128)
        out = pl.pallas_call(
            body,
            out_shape=jax.ShapeDtypeStruct((32, 128), jnp.float32),
            grid=(4,),
            in_specs=[pl.BlockSpec((8, 128), lambda i: (0, 0),
                                   pipeline_mode=pl.Buffered(1))],
            out_specs=pl.BlockSpec((8, 128), lambda i: (i, 0)),
        )(x)
        return bool(jnp.allclose(out, jnp.tile(x + 1.0, (4, 1))))
    except Exception:
        return False


def _const_spec(shape):
    """BlockSpec for a grid-invariant operand (weights / biases / LN params)
    on a 1-D grid.  Single-buffered when supported: double-buffering a
    constant block only doubles its VMEM footprint (w1+w2 of a BERT FFN)."""
    index_map = lambda i: (0,) * len(shape)
    if _buffered_ok():
        return pl.BlockSpec(shape, index_map, pipeline_mode=pl.Buffered(1))
    return pl.BlockSpec(shape, index_map)


def _cparams(n_axes=1):
    return pltpu.CompilerParams(
        dimension_semantics=("parallel",) * n_axes,
        vmem_limit_bytes=_VMEM_LIMIT)


# ----------------------------- Pallas kernels -------------------------------

def _linear_kernel(x_ref, w_ref, b_ref, o_ref):
    # o = x @ w + b          x:(tm,K) bf16, w:(K,N) bf16, b:(1,N) f32
    o_ref[...] = (
        jnp.dot(x_ref[...], w_ref[...], preferred_element_type=jnp.float32)
        + b_ref[...]
    ).astype(o_ref.dtype)


def _ln_kernel(x_ref, g_ref, b_ref, o_ref, *, eps):
    # o = LayerNorm(x) * g + b        (last-dim reduction, f32 stats)
    x = x_ref[...].astype(jnp.float32)
    mu = jnp.mean(x, axis=-1, keepdims=True)
    var = jnp.mean(jnp.square(x - mu), axis=-1, keepdims=True)
    y = (x - mu) * jax.lax.rsqrt(var + eps)
    o_ref[...] = (y * g_ref[...] + b_ref[...]).astype(o_ref.dtype)


def _proj_add_ln_kernel(x_ref, w_ref, b_ref, r_ref, g_ref, beta_ref, o_ref, *, eps):
    # o = LayerNorm(r + x @ w + b)    -- fused output-projection epilogue
    y = jnp.dot(x_ref[...], w_ref[...], preferred_element_type=jnp.float32) + b_ref[...]
    y = y + r_ref[...].astype(jnp.float32)
    mu = jnp.mean(y, axis=-1, keepdims=True)
    var = jnp.mean(jnp.square(y - mu), axis=-1, keepdims=True)
    y = (y - mu) * jax.lax.rsqrt(var + eps)
    o_ref[...] = (y * g_ref[...] + beta_ref[...]).astype(o_ref.dtype)


def _ffn_add_ln_kernel(x_ref, w1_ref, b1_ref, w2_ref, b2_ref, g_ref, beta_ref,
                       o_ref, *, eps):
    # o = LayerNorm(x + GELU(x @ w1 + b1) @ w2 + b2)
    x = x_ref[...]
    h = jnp.dot(x, w1_ref[...], preferred_element_type=jnp.float32) + b1_ref[...]
    # TODO(synk): PyTorch nn.GELU defaults to exact erf; tanh approximation kept
    # for guaranteed Mosaic lowering (small numeric difference).
    h = jax.nn.gelu(h, approximate=True)
    y = (jnp.dot(h.astype(x.dtype), w2_ref[...], preferred_element_type=jnp.float32)
         + b2_ref[...])
    y = y + x.astype(jnp.float32)
    mu = jnp.mean(y, axis=-1, keepdims=True)
    var = jnp.mean(jnp.square(y - mu), axis=-1, keepdims=True)
    y = (y - mu) * jax.lax.rsqrt(var + eps)
    o_ref[...] = (y * g_ref[...] + beta_ref[...]).astype(o_ref.dtype)


def _attention_kernel(qkv_ref, mq_ref, mk_ref, o_ref, *, hb, d_head, scale):
    # One (batch, head-group) tile: softmax(q k^T, pad-masked) v for hb heads.
    # qkv block columns are laid out [Q_g | K_g | V_g], each hb*d_head wide.
    G = hb * d_head
    S = qkv_ref.shape[0]
    q = (qkv_ref[:, 0 * G:1 * G] * scale).reshape(S, hb, d_head)   # scale folded into q
    k = qkv_ref[:, 1 * G:2 * G].reshape(S, hb, d_head)
    v = qkv_ref[:, 2 * G:3 * G].reshape(S, hb, d_head)

    # single combined pad mask: valid iff query row AND key column are non-pad
    valid = jnp.logical_and(mq_ref[0] != 0, mk_ref[0] != 0)        # (S, S)

    s = jnp.einsum("qhd,khd->hqk", q, k,
                   preferred_element_type=jnp.float32)             # (hb, S, S) f32
    s = jnp.where(valid, s, -1e9)
    s = s - jnp.max(s, axis=-1, keepdims=True)
    p = jnp.exp(s)
    p = p * pl.reciprocal(jnp.sum(p, axis=-1, keepdims=True))      # exact reciprocal
    o = jnp.einsum("hqk,khd->qhd", p.astype(v.dtype), v,
                   preferred_element_type=jnp.float32)             # (S, hb, d_head)
    # heads merged in-kernel -> lane-dense (S, hb*d_head) store
    o_ref[...] = o.reshape(S, G).astype(o_ref.dtype)


# ----------------------------- Pallas wrappers ------------------------------

def pallas_linear(x, w, b):
    M, K = x.shape
    N = w.shape[1]
    tm = _pick_tile(M)
    cost = pl.CostEstimate(
        flops=int(2 * M * K * N), transcendentals=0,
        bytes_accessed=int((M * K + K * N + M * N) * 2 + N * 4))
    return pl.pallas_call(
        _linear_kernel,
        out_shape=jax.ShapeDtypeStruct((M, N), jnp.bfloat16),
        grid=(M // tm,),
        in_specs=[
            pl.BlockSpec((tm, K), lambda i: (i, 0)),
            _const_spec((K, N)),
            _const_spec((1, N)),
        ],
        out_specs=pl.BlockSpec((tm, N), lambda i: (i, 0)),
        compiler_params=_cparams(1),
        cost_estimate=cost,
    )(x, w, b)


def pallas_layernorm(x, gamma, beta, eps):
    M, D = x.shape
    tm = _pick_tile(M)
    kern = functools.partial(_ln_kernel, eps=eps)
    cost = pl.CostEstimate(
        flops=int(8 * M * D), transcendentals=int(M),
        bytes_accessed=int(4 * M * D + 8 * D))
    return pl.pallas_call(
        kern,
        out_shape=jax.ShapeDtypeStruct((M, D), jnp.bfloat16),
        grid=(M // tm,),
        in_specs=[
            pl.BlockSpec((tm, D), lambda i: (i, 0)),
            _const_spec((1, D)),
            _const_spec((1, D)),
        ],
        out_specs=pl.BlockSpec((tm, D), lambda i: (i, 0)),
        compiler_params=_cparams(1),
        cost_estimate=cost,
    )(x, gamma, beta)


def pallas_proj_add_ln(x, w, b, res, gamma, beta, eps):
    M, K = x.shape
    D = w.shape[1]
    tm = _pick_tile(M)
    kern = functools.partial(_proj_add_ln_kernel, eps=eps)
    cost = pl.CostEstimate(
        flops=int(2 * M * K * D + 10 * M * D), transcendentals=int(M),
        bytes_accessed=int((M * K + K * D + 2 * M * D) * 2 + 12 * D))
    return pl.pallas_call(
        kern,
        out_shape=jax.ShapeDtypeStruct((M, D), jnp.bfloat16),
        grid=(M // tm,),
        in_specs=[
            pl.BlockSpec((tm, K), lambda i: (i, 0)),
            _const_spec((K, D)),
            _const_spec((1, D)),
            pl.BlockSpec((tm, D), lambda i: (i, 0)),     # residual stream
            _const_spec((1, D)),
            _const_spec((1, D)),
        ],
        out_specs=pl.BlockSpec((tm, D), lambda i: (i, 0)),
        compiler_params=_cparams(1),
        cost_estimate=cost,
    )(x, w, b, res, gamma, beta)


def pallas_ffn_add_ln(x, w1, b1, w2, b2, gamma, beta, eps):
    M, D = x.shape
    F = w1.shape[1]
    # Row tile capped at 256: keeps resident w1+w2 + the f32 (tm, F) GELU
    # intermediate within v7x's 64 MiB VMEM per TC (v5e/v6e have headroom).
    tm = _pick_tile(M, cap=256)
    kern = functools.partial(_ffn_add_ln_kernel, eps=eps)
    cost = pl.CostEstimate(
        flops=int(4 * M * D * F + 20 * M * F), transcendentals=int(M * F + M),
        bytes_accessed=int((2 * M * D + 2 * D * F) * 2 + (F + 3 * D) * 4))
    return pl.pallas_call(
        kern,
        out_shape=jax.ShapeDtypeStruct((M, D), jnp.bfloat16),
        grid=(M // tm,),
        in_specs=[
            pl.BlockSpec((tm, D), lambda i: (i, 0)),
            _const_spec((D, F)),
            _const_spec((1, F)),
            _const_spec((F, D)),
            _const_spec((1, D)),
            _const_spec((1, D)),
            _const_spec((1, D)),
        ],
        out_specs=pl.BlockSpec((tm, D), lambda i: (i, 0)),
        compiler_params=_cparams(1),
        cost_estimate=cost,
    )(x, w1, b1, w2, b2, gamma, beta)


def pallas_attention(qkv, mask_q, mask_k, *, n_heads, heads_per_group, d_head,
                     seq_len):
    # qkv: (M, 3D) bf16, column layout per head group g: [Q_g | K_g | V_g].
    # mask_q: (B, S, 1) int32;  mask_k: (B, 1, S) int32.
    M, three_d = qkv.shape
    D = three_d // 3
    B = M // seq_len
    hb = heads_per_group
    G = hb * d_head
    n_groups = n_heads // hb
    scale = 1.0 / math.sqrt(d_head)
    kern = functools.partial(_attention_kernel, hb=hb, d_head=d_head, scale=scale)
    cost = pl.CostEstimate(
        flops=int(4 * B * n_heads * seq_len * seq_len * d_head),
        transcendentals=int(B * n_heads * seq_len * seq_len),
        bytes_accessed=int((M * three_d + M * D) * 2
                           + (mask_q.size + mask_k.size) * 4))
    return pl.pallas_call(
        kern,
        out_shape=jax.ShapeDtypeStruct((M, D), jnp.bfloat16),
        grid=(B, n_groups),
        in_specs=[
            pl.BlockSpec((seq_len, 3 * G), lambda b, g: (b, g)),
            pl.BlockSpec((1, seq_len, 1), lambda b, g: (b, 0, 0)),
            pl.BlockSpec((1, 1, seq_len), lambda b, g: (b, 0, 0)),
        ],
        out_specs=pl.BlockSpec((seq_len, G), lambda b, g: (b, g)),
        compiler_params=_cparams(2),
        cost_estimate=cost,
    )(qkv, mask_q, mask_k)


# ------------------------------ BERT forward --------------------------------

def bert_forward(params, x, *, n_heads, eps, pad_symbol, mask=None, token_type=None):
    B, S = x.shape
    D = params["tok_emb"].shape[1]
    Dh = D // n_heads
    hb = _heads_per_group(n_heads, Dh)
    M = B * S

    if mask is None:
        nonpad = (x != pad_symbol).astype(jnp.int32)                 # (B, S)
    else:
        # TODO(synk): assumes the user-supplied (B,S,S) mask is the outer
        # product of a per-token validity vector (as produced by _gen_mask).
        nonpad = jnp.diagonal(mask, axis1=1, axis2=2).astype(jnp.int32)
    mask_q = nonpad[:, :, None]                                      # (B, S, 1)
    mask_k = nonpad[:, None, :]                                      # (B, 1, S)

    if token_type is None:
        token_type = jnp.zeros((B, S), dtype=jnp.int32)

    # ---- BERTEmbedding: token + position + segment, then LayerNorm ----
    # TODO(synk): the gathers stay in XLA; the sum is cast to bf16 to halve the
    # HBM round-trip into the LN kernel (full gather+LN fusion would need
    # scalar-prefetched token ids).
    emb = (params["tok_emb"][x]
           + params["pos_emb"][:S][None, :, :]
           + params["seg_emb"][token_type]).astype(jnp.bfloat16)     # (B, S, D)
    h = pallas_layernorm(emb.reshape(M, D),
                         params["emb_ln_g"], params["emb_ln_b"], eps)  # (M, D) bf16

    # ---- Encoder stack (post-LN transformer blocks) ----
    for layer in params["layers"]:
        # Fused, head-group-permuted QKV projection: one [D, 3D] matmul.
        qkv = pallas_linear(h, layer["wqkv"], layer["bqkv"])         # (M, 3D) bf16

        # Attention consumes the (M, 3D) activation directly (no host-side
        # transposes) and writes a lane-dense (M, D) head-merged output.
        attn = pallas_attention(qkv, mask_q, mask_k,
                                n_heads=n_heads, heads_per_group=hb,
                                d_head=Dh, seq_len=S)                # (M, D) bf16

        # Output projection fused with residual-add + LayerNorm.
        h = pallas_proj_add_ln(attn, layer["wo"], layer["bo"], h,
                               layer["ln1_g"], layer["ln1_b"], eps)

        # FFN fused with residual-add + LayerNorm.
        h = pallas_ffn_add_ln(h, layer["w1"], layer["b1"],
                              layer["w2"], layer["b2"],
                              layer["ln2_g"], layer["ln2_b"], eps)

    return h.reshape(B, S, D).astype(jnp.float32)


# --------------------------- pure-JAX reference ------------------------------

def bert_reference(raw_params, x, *, n_heads, eps, pad_symbol, token_type=None):
    """f32 reference of the same forward pass (for numerical validation)."""
    B, S = x.shape
    D = raw_params["tok_emb"].shape[1]
    Dh = D // n_heads
    nonpad = x != pad_symbol
    valid = nonpad[:, None, :, None] & nonpad[:, None, None, :]      # (B,1,S,S)
    if token_type is None:
        token_type = jnp.zeros((B, S), jnp.int32)

    def ln(y, g, b):
        mu = jnp.mean(y, -1, keepdims=True)
        var = jnp.mean((y - mu) ** 2, -1, keepdims=True)
        return (y - mu) * jax.lax.rsqrt(var + eps) * g + b

    h = (raw_params["tok_emb"][x] + raw_params["pos_emb"][:S][None]
         + raw_params["seg_emb"][token_type])
    h = ln(h, raw_params["emb_ln_g"], raw_params["emb_ln_b"])
    for L in raw_params["layers"]:
        q = (h @ L["wq"] + L["bq"]).reshape(B, S, n_heads, Dh).transpose(0, 2, 1, 3)
        k = (h @ L["wk"] + L["bk"]).reshape(B, S, n_heads, Dh).transpose(0, 2, 1, 3)
        v = (h @ L["wv"] + L["bv"]).reshape(B, S, n_heads, Dh).transpose(0, 2, 1, 3)
        s = jnp.einsum("bhqd,bhkd->bhqk", q, k) / math.sqrt(Dh)
        s = jnp.where(valid, s, -1e9)
        p = jax.nn.softmax(s, axis=-1)
        a = jnp.einsum("bhqk,bhkd->bhqd", p, v).transpose(0, 2, 1, 3).reshape(B, S, D)
        h = ln(h + a @ L["wo"] + L["bo"], L["ln1_g"], L["ln1_b"])
        f = jax.nn.gelu(h @ L["w1"] + L["b1"], approximate=True)
        h = ln(h + f @ L["w2"] + L["b2"], L["ln2_g"], L["ln2_b"])
    return h


# ------------------------------ init & prep ----------------------------------

def init_params(key, vocab, max_len, dim, n_layers, ff_dim):
    """f32 parameters mirroring the PyTorch module layout."""
    def nrm(k, shape):
        return jax.random.normal(k, shape, dtype=jnp.float32) * 0.02

    keys = jax.random.split(key, 3 + n_layers)
    params = {
        "tok_emb": nrm(keys[0], (vocab, dim)),
        "pos_emb": nrm(keys[1], (max_len, dim)),
        "seg_emb": nrm(keys[2], (2, dim)),
        "emb_ln_g": jnp.ones((1, dim), jnp.float32),
        "emb_ln_b": jnp.zeros((1, dim), jnp.float32),
        "layers": [],
    }
    for i in range(n_layers):
        lk = jax.random.split(keys[3 + i], 6)
        params["layers"].append({
            "wq": nrm(lk[0], (dim, dim)), "bq": jnp.zeros((1, dim), jnp.float32),
            "wk": nrm(lk[1], (dim, dim)), "bk": jnp.zeros((1, dim), jnp.float32),
            "wv": nrm(lk[2], (dim, dim)), "bv": jnp.zeros((1, dim), jnp.float32),
            "wo": nrm(lk[3], (dim, dim)), "bo": jnp.zeros((1, dim), jnp.float32),
            "ln1_g": jnp.ones((1, dim), jnp.float32),
            "ln1_b": jnp.zeros((1, dim), jnp.float32),
            "w1": nrm(lk[4], (dim, ff_dim)), "b1": jnp.zeros((1, ff_dim), jnp.float32),
            "w2": nrm(lk[5], (ff_dim, dim)), "b2": jnp.zeros((1, dim), jnp.float32),
            "ln2_g": jnp.ones((1, dim), jnp.float32),
            "ln2_b": jnp.zeros((1, dim), jnp.float32),
        })
    return params


def prepare_params(params, *, n_heads):
    """Fuse + head-group-permute QKV weights; cast matmul weights to bf16
    (biases / LN params stay f32)."""
    D = params["tok_emb"].shape[1]
    Dh = D // n_heads
    hb = _heads_per_group(n_heads, Dh)
    n_groups = n_heads // hb
    G = hb * Dh

    def fuse_w(wq, wk, wv):
        # columns per head group g: [Q_g | K_g | V_g], each G = hb*Dh wide
        parts = [w.reshape(D, n_groups, G) for w in (wq, wk, wv)]
        return jnp.stack(parts, axis=2).reshape(D, 3 * D)

    def fuse_b(bq, bk, bv):
        parts = [b.reshape(1, n_groups, G) for b in (bq, bk, bv)]
        return jnp.stack(parts, axis=2).reshape(1, 3 * D)

    prep = {
        "tok_emb": params["tok_emb"],
        "pos_emb": params["pos_emb"],
        "seg_emb": params["seg_emb"],
        "emb_ln_g": params["emb_ln_g"],
        "emb_ln_b": params["emb_ln_b"],
        "layers": [],
    }
    for layer in params["layers"]:
        prep["layers"].append({
            "wqkv": fuse_w(layer["wq"], layer["wk"], layer["wv"]).astype(jnp.bfloat16),
            "bqkv": fuse_b(layer["bq"], layer["bk"], layer["bv"]),
            "wo": layer["wo"].astype(jnp.bfloat16), "bo": layer["bo"],
            "ln1_g": layer["ln1_g"], "ln1_b": layer["ln1_b"],
            "w1": layer["w1"].astype(jnp.bfloat16), "b1": layer["b1"],
            "w2": layer["w2"].astype(jnp.bfloat16), "b2": layer["b2"],
            "ln2_g": layer["ln2_g"], "ln2_b": layer["ln2_b"],
        })
    return prep


if __name__ == "__main__":
    # Small BERT config
    B, S = 2, 8
    DIM, N_HEADS, N_LAYERS, FF_DIM = 32, 4, 2, 64
    VOCAB, MAX_LEN = 50, 64
    EPS = 1e-6
    PAD = 0

    key = jax.random.PRNGKey(0)
    k_x, k_p = jax.random.split(key)

    # deterministic example token ids, with some pad tokens in sequence 0
    x = jax.random.randint(k_x, (B, S), 1, VOCAB, dtype=jnp.int32)
    x = x.at[0, -2:].set(PAD)

    raw_params = init_params(k_p, VOCAB, MAX_LEN, DIM, N_LAYERS, FF_DIM)
    params = prepare_params(raw_params, n_heads=N_HEADS)

    fwd = jax.jit(functools.partial(bert_forward,
                                    n_heads=N_HEADS, eps=EPS, pad_symbol=PAD))
    out = fwd(params, x)
    jax.block_until_ready(out)

    # validate against the pure-JAX f32 reference (bf16-tolerant threshold)
    ref = bert_reference(raw_params, x, n_heads=N_HEADS, eps=EPS, pad_symbol=PAD)
    err = float(jnp.max(jnp.abs(out - ref)))

    assert out.shape == (B, S, DIM)
    assert jnp.all(jnp.isfinite(out))
    assert err < 0.1, f"mismatch vs reference: max abs err {err}"
    print("KERNEL_OK")
</pallas_src>

<mosaic_0001>
module attributes {stable_mosaic.version = 11 : i64} {
  func.func @_linear_kernel(%arg0: i32, %arg1: memref<16x32xbf16, #tpu.memory_space<vmem>>, %arg2: memref<32x96xbf16, #tpu.memory_space<vmem>>, %arg3: memref<1x96xf32, #tpu.memory_space<vmem>>, %arg4: memref<16x96xbf16, #tpu.memory_space<vmem>>) attributes {dimension_semantics = [#tpu.dimension_semantics<parallel>], iteration_bounds = array<i64: 1>, scalar_prefetch = 0 : i64, scratch_operands = 0 : i64, tpu.core_type = #tpu.core_type<tc>, window_params = [{transform_indices = @transform_0, window_bounds = array<i64: 16, 32>}, {pipeline_mode = #tpu.pipeline_mode<synchronous>, transform_indices = @transform_1, window_bounds = array<i64: 32, 96>}, {pipeline_mode = #tpu.pipeline_mode<synchronous>, transform_indices = @transform_2, window_bounds = array<i64: 1, 96>}, {transform_indices = @transform_3, window_bounds = array<i64: 16, 96>}]} {
    %c0 = arith.constant 0 : index
    %c0_0 = arith.constant 0 : index
    %0 = vector.load %arg1[%c0, %c0_0] : memref<16x32xbf16, #tpu.memory_space<vmem>>, vector<16x32xbf16>
    %c0_1 = arith.constant 0 : index
    %c0_2 = arith.constant 0 : index
    %1 = vector.load %arg2[%c0_1, %c0_2] : memref<32x96xbf16, #tpu.memory_space<vmem>>, vector<32x96xbf16>
    %cst = arith.constant dense<0.000000e+00> : vector<16x96xf32>
    %2 = tpu.matmul %0, %1, %cst {dimension_numbers = #tpu.dot_dimension_numbers<[1], [0], [0], [1], [0, 0, 1, 1], [], []>} : vector<16x32xbf16>, vector<32x96xbf16>, vector<16x96xf32> -> vector<16x96xf32>
    %c0_3 = arith.constant 0 : index
    %c0_4 = arith.constant 0 : index
    %3 = vector.load %arg3[%c0_3, %c0_4] : memref<1x96xf32, #tpu.memory_space<vmem>>, vector<1x96xf32>
    %4 = vector.broadcast %3 : vector<1x96xf32> to vector<16x96xf32>
    %5 = arith.addf %2, %4 : vector<16x96xf32>
    %6 = arith.truncf %5 : vector<16x96xf32> to vector<16x96xbf16>
    %c0_5 = arith.constant 0 : index
    %c0_6 = arith.constant 0 : index
    %7 = vector.load %arg4[%c0_5, %c0_6] : memref<16x96xbf16, #tpu.memory_space<vmem>>, vector<16x96xbf16>
    tpu.vector_store %arg4[%c0_5, %c0_6], %6 {strides = array<i32>} : memref<16x96xbf16, #tpu.memory_space<vmem>>, vector<16x96xbf16>,
    return
  }
  func.func @transform_0(%arg0: i32) -> (i32, i32) {
    %c0_i32 = arith.constant 0 : i32
    %c0_i32_0 = arith.constant 0 : i32
    return %arg0, %c0_i32 : i32, i32
  }
  func.func @transform_1(%arg0: i32) -> (i32, i32) {
    %c0_i32 = arith.constant 0 : i32
    %c0_i32_0 = arith.constant 0 : i32
    %c0_i32_1 = arith.constant 0 : i32
    return %c0_i32, %c0_i32_0 : i32, i32
  }
  func.func @transform_2(%arg0: i32) -> (i32, i32) {
    %c0_i32 = arith.constant 0 : i32
    %c0_i32_0 = arith.constant 0 : i32
    %c0_i32_1 = arith.constant 0 : i32
    return %c0_i32, %c0_i32_0 : i32, i32
  }
  func.func @transform_3(%arg0: i32) -> (i32, i32) {
    %c0_i32 = arith.constant 0 : i32
    %c0_i32_0 = arith.constant 0 : i32
    return %arg0, %c0_i32 : i32, i32
  }
}

module attributes {stable_mosaic.version = 11 : i64} {
  func.func @_ln_kernel(%arg0: i32, %arg1: memref<16x32xbf16, #tpu.memory_space<vmem>>, %arg2: memref<1x32xf32, #tpu.memory_space<vmem>>, %arg3: memref<1x32xf32, #tpu.memory_space<vmem>>, %arg4: memref<16x32xbf16, #tpu.memory_space<vmem>>) attributes {dimension_semantics = [#tpu.dimension_semantics<parallel>], iteration_bounds = array<i64: 1>, scalar_prefetch = 0 : i64, scratch_operands = 0 : i64, tpu.core_type = #tpu.core_type<tc>, window_params = [{transform_indices = @transform_0, window_bounds = array<i64: 16, 32>}, {pipeline_mode = #tpu.pipeline_mode<synchronous>, transform_indices = @transform_1, window_bounds = array<i64: 1, 32>}, {pipeline_mode = #tpu.pipeline_mode<synchronous>, transform_indices = @transform_2, window_bounds = array<i64: 1, 32>}, {transform_indices = @transform_3, window_bounds = array<i64: 16, 32>}]} {
    %c0 = arith.constant 0 : index
    %c0_0 = arith.constant 0 : index
    %0 = vector.load %arg1[%c0, %c0_0] : memref<16x32xbf16, #tpu.memory_space<vmem>>, vector<16x32xbf16>
    %1 = arith.extf %0 : vector<16x32xbf16> to vector<16x32xf32>
    %cst = arith.constant dense<0.000000e+00> : vector<16xf32>
    %2 = vector.multi_reduction <add>, %1, %cst [1] : vector<16x32xf32> to vector<16xf32>
    %3 = vector.shape_cast %2 : vector<16xf32> to vector<16x1xf32>
    %cst_1 = arith.constant 3.200000e+01 : f32
    %4 = vector.broadcast %cst_1 : f32 to vector<16x1xf32>
    %5 = arith.divf %3, %4 : vector<16x1xf32>
    %6 = vector.broadcast %5 : vector<16x1xf32> to vector<16x32xf32>
    %7 = arith.subf %1, %6 : vector<16x32xf32>
    %8 = arith.mulf %7, %7 : vector<16x32xf32>
    %cst_2 = arith.constant dense<0.000000e+00> : vector<16xf32>
    %9 = vector.multi_reduction <add>, %8, %cst_2 [1] : vector<16x32xf32> to vector<16xf32>
    %10 = vector.shape_cast %9 : vector<16xf32> to vector<16x1xf32>
    %cst_3 = arith.constant 3.200000e+01 : f32
    %11 = vector.broadcast %cst_3 : f32 to vector<16x1xf32>
    %12 = arith.divf %10, %11 : vector<16x1xf32>
    %13 = vector.broadcast %5 : vector<16x1xf32> to vector<16x32xf32>
    %14 = arith.subf %1, %13 : vector<16x32xf32>
    %cst_4 = arith.constant 9.99999997E-7 : f32
    %15 = vector.broadcast %cst_4 : f32 to vector<16x1xf32>
    %16 = arith.addf %12, %15 : vector<16x1xf32>
    %17 = math.rsqrt %16 : vector<16x1xf32>
    %18 = vector.broadcast %17 : vector<16x1xf32> to vector<16x32xf32>
    %19 = arith.mulf %14, %18 : vector<16x32xf32>
    %c0_5 = arith.constant 0 : index
    %c0_6 = arith.constant 0 : index
    %20 = vector.load %arg2[%c0_5, %c0_6] : memref<1x32xf32, #tpu.memory_space<vmem>>, vector<1x32xf32>
    %21 = vector.broadcast %20 : vector<1x32xf32> to vector<16x32xf32>
    %22 = arith.mulf %19, %21 : vector<16x32xf32>
    %c0_7 = arith.constant 0 : index
    %c0_8 = arith.constant 0 : index
    %23 = vector.load %arg3[%c0_7, %c0_8] : memref<1x32xf32, #tpu.memory_space<vmem>>, vector<1x32xf32>
    %24 = vector.broadcast %23 : vector<1x32xf32> to vector<16x32xf32>
    %25 = arith.addf %22, %24 : vector<16x32xf32>
    %26 = arith.truncf %25 : vector<16x32xf32> to vector<16x32xbf16>
    %c0_9 = arith.constant 0 : index
    %c0_10 = arith.constant 0 : index
    %27 = vector.load %arg4[%c0_9, %c0_10] : memref<16x32xbf16, #tpu.memory_space<vmem>>, vector<16x32xbf16>
    tpu.vector_store %arg4[%c0_9, %c0_10], %26 {strides = array<i32>} : memref<16x32xbf16, #tpu.memory_space<vmem>>, vector<16x32xbf16>,
    return
  }
  func.func @transform_0(%arg0: i32) -> (i32, i32) {
    %c0_i32 = arith.constant 0 : i32
    %c0_i32_0 = arith.constant 0 : i32
    return %arg0, %c0_i32 : i32, i32
  }
  func.func @transform_1(%arg0: i32) -> (i32, i32) {
    %c0_i32 = arith.constant 0 : i32
    %c0_i32_0 = arith.constant 0 : i32
    %c0_i32_1 = arith.constant 0 : i32
    return %c0_i32, %c0_i32_0 : i32, i32
  }
  func.func @transform_2(%arg0: i32) -> (i32, i32) {
    %c0_i32 = arith.constant 0 : i32
    %c0_i32_0 = arith.constant 0 : i32
    %c0_i32_1 = arith.constant 0 : i32
    return %c0_i32, %c0_i32_0 : i32, i32
  }
  func.func @transform_3(%arg0: i32) -> (i32, i32) {
    %c0_i32 = arith.constant 0 : i32
    %c0_i32_0 = arith.constant 0 : i32
    return %arg0, %c0_i32 : i32, i32
  }
}

module attributes {stable_mosaic.version = 11 : i64} {
  func.func @_attention_kernel(%arg0: i32, %arg1: i32, %arg2: memref<8x96xbf16, #tpu.memory_space<vmem>>, %arg3: memref<1x8x1xi32, #tpu.memory_space<vmem>>, %arg4: memref<1x1x8xi32, #tpu.memory_space<vmem>>, %arg5: memref<8x32xbf16, #tpu.memory_space<vmem>>) attributes {dimension_semantics = [#tpu.dimension_semantics<parallel>, #tpu.dimension_semantics<parallel>], iteration_bounds = array<i64: 2, 1>, scalar_prefetch = 0 : i64, scratch_operands = 0 : i64, tpu.core_type = #tpu.core_type<tc>, window_params = [{transform_indices = @transform_0, window_bounds = array<i64: 8, 96>}, {transform_indices = @transform_1, window_bounds = array<i64: 1, 8, 1>}, {transform_indices = @transform_2, window_bounds = array<i64: 1, 1, 8>}, {transform_indices = @transform_3, window_bounds = array<i64: 8, 32>}]} {
    %c0 = arith.constant 0 : index
    %c0_0 = arith.constant 0 : index
    %0 = vector.load %arg2[%c0, %c0_0] : memref<8x96xbf16, #tpu.memory_space<vmem>>, vector<8x32xbf16>
    %cst = arith.constant 3.535160e-01 : bf16
    %1 = vector.broadcast %cst : bf16 to vector<8x32xbf16>
    %2 = arith.mulf %0, %1 : vector<8x32xbf16>
    %3 = vector.shape_cast %2 : vector<8x32xbf16> to vector<8x4x8xbf16>
    %c0_1 = arith.constant 0 : index
    %c32 = arith.constant 32 : index
    %4 = vector.load %arg2[%c0_1, %c32] : memref<8x96xbf16, #tpu.memory_space<vmem>>, vector<8x32xbf16>
    %5 = vector.shape_cast %4 : vector<8x32xbf16> to vector<8x4x8xbf16>
    %c0_2 = arith.constant 0 : index
    %c64 = arith.constant 64 : index
    %6 = vector.load %arg2[%c0_2, %c64] : memref<8x96xbf16, #tpu.memory_space<vmem>>, vector<8x32xbf16>
    %7 = vector.shape_cast %6 : vector<8x32xbf16> to vector<8x4x8xbf16>
    %c0_3 = arith.constant 0 : index
    %c0_4 = arith.constant 0 : index
    %c0_5 = arith.constant 0 : index
    %8 = vector.load %arg3[%c0_3, %c0_4, %c0_5] : memref<1x8x1xi32, #tpu.memory_space<vmem>>, vector<1x8x1xi32>
    %9 = vector.shape_cast %8 : vector<1x8x1xi32> to vector<8x1xi32>
    %c0_i32 = arith.constant 0 : i32
    %10 = vector.broadcast %c0_i32 : i32 to vector<8x1xi32>
    %11 = arith.cmpi ne, %9, %10 : vector<8x1xi32>
    %c0_6 = arith.constant 0 : index
    %c0_7 = arith.constant 0 : index
    %c0_8 = arith.constant 0 : index
    %12 = vector.load %arg4[%c0_6, %c0_7, %c0_8] : memref<1x1x8xi32, #tpu.memory_space<vmem>>, vector<1x1x8xi32>
    %13 = vector.shape_cast %12 : vector<1x1x8xi32> to vector<1x8xi32>
    %c0_i32_9 = arith.constant 0 : i32
    %14 = vector.broadcast %c0_i32_9 : i32 to vector<1x8xi32>
    %15 = arith.cmpi ne, %13, %14 : vector<1x8xi32>
    %16 = vector.broadcast %11 : vector<8x1xi1> to vector<8x8xi1>
    %17 = vector.broadcast %15 : vector<1x8xi1> to vector<8x8xi1>
    %18 = arith.andi %16, %17 : vector<8x8xi1>
    "tpu.trace_start"() <{level = 10 : i32, message = "qhd,khd->hqk"}> : () -> ()
    %cst_10 = arith.constant dense<0.000000e+00> : vector<4x8x8xf32>
    %19 = tpu.matmul %3, %5, %cst_10 {dimension_numbers = #tpu.dot_dimension_numbers<[2], [2], [0], [0], [0, 1, 0, 0, 1, 0], [1], [1]>} : vector<8x4x8xbf16>, vector<8x4x8xbf16>, vector<4x8x8xf32> -> vector<4x8x8xf32>
    %cst_11 = arith.constant -1.000000e+09 : f32
    "tpu.trace_stop"() : () -> ()
    %20 = vector.shape_cast %18 : vector<8x8xi1> to vector<1x8x8xi1>
    %21 = vector.broadcast %20 : vector<1x8x8xi1> to vector<4x8x8xi1>
    %22 = vector.broadcast %cst_11 : f32 to vector<4x8x8xf32>
    %23 = arith.select %21, %19, %22 : vector<4x8x8xi1>, vector<4x8x8xf32>
    %cst_12 = arith.constant dense<0xFF800000> : vector<4x8xf32>
    %24 = vector.multi_reduction <maximumf>, %23, %cst_12 [2] : vector<4x8x8xf32> to vector<4x8xf32>
    %25 = vector.shape_cast %24 : vector<4x8xf32> to vector<4x8x1xf32>
    %26 = vector.broadcast %25 : vector<4x8x1xf32> to vector<4x8x8xf32>
    %27 = arith.subf %23, %26 : vector<4x8x8xf32>
    %28 = math.exp %27 : vector<4x8x8xf32>
    %cst_13 = arith.constant dense<0.000000e+00> : vector<4x8xf32>
    %29 = vector.multi_reduction <add>, %28, %cst_13 [2] : vector<4x8x8xf32> to vector<4x8xf32>
    %30 = vector.shape_cast %29 : vector<4x8xf32> to vector<4x8x1xf32>
    %31 = tpu.reciprocal %30 : vector<4x8x1xf32> -> vector<4x8x1xf32>
    %32 = vector.broadcast %31 : vector<4x8x1xf32> to vector<4x8x8xf32>
    %33 = arith.mulf %28, %32 : vector<4x8x8xf32>
    %34 = arith.truncf %33 : vector<4x8x8xf32> to vector<4x8x8xbf16>
    "tpu.trace_start"() <{level = 10 : i32, message = "hqk,khd->qhd"}> : () -> ()
    %cst_14 = arith.constant dense<0.000000e+00> : vector<4x8x8xf32>
    %35 = tpu.matmul %7, %34, %cst_14 {dimension_numbers = #tpu.dot_dimension_numbers<[0], [2], [2], [1], [0, 1, 0, 2, 1, 1], [1], [0]>} : vector<8x4x8xbf16>, vector<4x8x8xbf16>, vector<4x8x8xf32> -> vector<4x8x8xf32>
    %36 = tpu.transpose %35, [2, 0, 1] : vector<4x8x8xf32> -> vector<8x4x8xf32>
    "tpu.trace_stop"() : () -> ()
    %37 = vector.shape_cast %36 : vector<8x4x8xf32> to vector<8x32xf32>
    %38 = arith.truncf %37 : vector<8x32xf32> to vector<8x32xbf16>
    %c0_15 = arith.constant 0 : index
    %c0_16 = arith.constant 0 : index
    %39 = vector.load %arg5[%c0_15, %c0_16] : memref<8x32xbf16, #tpu.memory_space<vmem>>, vector<8x32xbf16>
    tpu.vector_store %arg5[%c0_15, %c0_16], %38 {strides = array<i32>} : memref<8x32xbf16, #tpu.memory_space<vmem>>, vector<8x32xbf16>,
    return
  }
  func.func @transform_0(%arg0: i32, %arg1: i32) -> (i32, i32) {
    %c0_i32 = arith.constant 0 : i32
    return %arg0, %arg1 : i32, i32
  }
  func.func @transform_1(%arg0: i32, %arg1: i32) -> (i32, i32, i32) {
    %c0_i32 = arith.constant 0 : i32
    %c0_i32_0 = arith.constant 0 : i32
    %c0_i32_1 = arith.constant 0 : i32
    return %arg0, %c0_i32, %c0_i32_0 : i32, i32, i32
  }
  func.func @transform_2(%arg0: i32, %arg1: i32) -> (i32, i32, i32) {
    %c0_i32 = arith.constant 0 : i32
    %c0_i32_0 = arith.constant 0 : i32
    %c0_i32_1 = arith.constant 0 : i32
    return %arg0, %c0_i32, %c0_i32_0 : i32, i32, i32
  }
  func.func @transform_3(%arg0: i32, %arg1: i32) -> (i32, i32) {
    %c0_i32 = arith.constant 0 : i32
    return %arg0, %arg1 : i32, i32
  }
}

module attributes {stable_mosaic.version = 11 : i64} {
  func.func @_proj_add_ln_kernel(%arg0: i32, %arg1: memref<16x32xbf16, #tpu.memory_space<vmem>>, %arg2: memref<32x32xbf16, #tpu.memory_space<vmem>>, %arg3: memref<1x32xf32, #tpu.memory_space<vmem>>, %arg4: memref<16x32xbf16, #tpu.memory_space<vmem>>, %arg5: memref<1x32xf32, #tpu.memory_space<vmem>>, %arg6: memref<1x32xf32, #tpu.memory_space<vmem>>, %arg7: memref<16x32xbf16, #tpu.memory_space<vmem>>) attributes {dimension_semantics = [#tpu.dimension_semantics<parallel>], iteration_bounds = array<i64: 1>, scalar_prefetch = 0 : i64, scratch_operands = 0 : i64, tpu.core_type = #tpu.core_type<tc>, window_params = [{transform_indices = @transform_0, window_bounds = array<i64: 16, 32>}, {pipeline_mode = #tpu.pipeline_mode<synchronous>, transform_indices = @transform_1, window_bounds = array<i64: 32, 32>}, {pipeline_mode = #tpu.pipeline_mode<synchronous>, transform_indices = @transform_2, window_bounds = array<i64: 1, 32>}, {transform_indices = @transform_3, window_bounds = array<i64: 16, 32>}, {pipeline_mode = #tpu.pipeline_mode<synchronous>, transform_indices = @transform_4, window_bounds = array<i64: 1, 32>}, {pipeline_mode = #tpu.pipeline_mode<synchronous>, transform_indices = @transform_5, window_bounds = array<i64: 1, 32>}, {transform_indices = @transform_6, window_bounds = array<i64: 16, 32>}]} {
    %c0 = arith.constant 0 : index
    %c0_0 = arith.constant 0 : index
    %0 = vector.load %arg1[%c0, %c0_0] : memref<16x32xbf16, #tpu.memory_space<vmem>>, vector<16x32xbf16>
    %c0_1 = arith.constant 0 : index
    %c0_2 = arith.constant 0 : index
    %1 = vector.load %arg2[%c0_1, %c0_2] : memref<32x32xbf16, #tpu.memory_space<vmem>>, vector<32x32xbf16>
    %cst = arith.constant dense<0.000000e+00> : vector<16x32xf32>
    %2 = tpu.matmul %0, %1, %cst {dimension_numbers = #tpu.dot_dimension_numbers<[1], [0], [0], [1], [0, 0, 1, 1], [], []>} : vector<16x32xbf16>, vector<32x32xbf16>, vector<16x32xf32> -> vector<16x32xf32>
    %c0_3 = arith.constant 0 : index
    %c0_4 = arith.constant 0 : index
    %3 = vector.load %arg3[%c0_3, %c0_4] : memref<1x32xf32, #tpu.memory_space<vmem>>, vector<1x32xf32>
    %4 = vector.broadcast %3 : vector<1x32xf32> to vector<16x32xf32>
    %5 = arith.addf %2, %4 : vector<16x32xf32>
    %c0_5 = arith.constant 0 : index
    %c0_6 = arith.constant 0 : index
    %6 = vector.load %arg4[%c0_5, %c0_6] : memref<16x32xbf16, #tpu.memory_space<vmem>>, vector<16x32xbf16>
    %7 = arith.extf %6 : vector<16x32xbf16> to vector<16x32xf32>
    %8 = arith.addf %5, %7 : vector<16x32xf32>
    %cst_7 = arith.constant dense<0.000000e+00> : vector<16xf32>
    %9 = vector.multi_reduction <add>, %8, %cst_7 [1] : vector<16x32xf32> to vector<16xf32>
    %10 = vector.shape_cast %9 : vector<16xf32> to vector<16x1xf32>
    %cst_8 = arith.constant 3.200000e+01 : f32
    %11 = vector.broadcast %cst_8 : f32 to vector<16x1xf32>
    %12 = arith.divf %10, %11 : vector<16x1xf32>
    %13 = vector.broadcast %12 : vector<16x1xf32> to vector<16x32xf32>
    %14 = arith.subf %8, %13 : vector<16x32xf32>
    %15 = arith.mulf %14, %14 : vector<16x32xf32>
    %cst_9 = arith.constant dense<0.000000e+00> : vector<16xf32>
    %16 = vector.multi_reduction <add>, %15, %cst_9 [1] : vector<16x32xf32> to vector<16xf32>
    %17 = vector.shape_cast %16 : vector<16xf32> to vector<16x1xf32>
    %cst_10 = arith.constant 3.200000e+01 : f32
    %18 = vector.broadcast %cst_10 : f32 to vector<16x1xf32>
    %19 = arith.divf %17, %18 : vector<16x1xf32>
    %20 = vector.broadcast %12 : vector<16x1xf32> to vector<16x32xf32>
    %21 = arith.subf %8, %20 : vector<16x32xf32>
    %cst_11 = arith.constant 9.99999997E-7 : f32
    %22 = vector.broadcast %cst_11 : f32 to vector<16x1xf32>
    %23 = arith.addf %19, %22 : vector<16x1xf32>
    %24 = math.rsqrt %23 : vector<16x1xf32>
    %25 = vector.broadcast %24 : vector<16x1xf32> to vector<16x32xf32>
    %26 = arith.mulf %21, %25 : vector<16x32xf32>
    %c0_12 = arith.constant 0 : index
    %c0_13 = arith.constant 0 : index
    %27 = vector.load %arg5[%c0_12, %c0_13] : memref<1x32xf32, #tpu.memory_space<vmem>>, vector<1x32xf32>
    %28 = vector.broadcast %27 : vector<1x32xf32> to vector<16x32xf32>
    %29 = arith.mulf %26, %28 : vector<16x32xf32>
    %c0_14 = arith.constant 0 : index
    %c0_15 = arith.constant 0 : index
    %30 = vector.load %arg6[%c0_14, %c0_15] : memref<1x32xf32, #tpu.memory_space<vmem>>, vector<1x32xf32>
    %31 = vector.broadcast %30 : vector<1x32xf32> to vector<16x32xf32>
    %32 = arith.addf %29, %31 : vector<16x32xf32>
    %33 = arith.truncf %32 : vector<16x32xf32> to vector<16x32xbf16>
    %c0_16 = arith.constant 0 : index
    %c0_17 = arith.constant 0 : index
    %34 = vector.load %arg7[%c0_16, %c0_17] : memref<16x32xbf16, #tpu.memory_space<vmem>>, vector<16x32xbf16>
    tpu.vector_store %arg7[%c0_16, %c0_17], %33 {strides = array<i32>} : memref<16x32xbf16, #tpu.memory_space<vmem>>, vector<16x32xbf16>,
    return
  }
  func.func @transform_0(%arg0: i32) -> (i32, i32) {
    %c0_i32 = arith.constant 0 : i32
    %c0_i32_0 = arith.constant 0 : i32
    return %arg0, %c0_i32 : i32, i32
  }
  func.func @transform_1(%arg0: i32) -> (i32, i32) {
    %c0_i32 = arith.constant 0 : i32
    %c0_i32_0 = arith.constant 0 : i32
    %c0_i32_1 = arith.constant 0 : i32
    return %c0_i32, %c0_i32_0 : i32, i32
  }
  func.func @transform_2(%arg0: i32) -> (i32, i32) {
    %c0_i32 = arith.constant 0 : i32
    %c0_i32_0 = arith.constant 0 : i32
    %c0_i32_1 = arith.constant 0 : i32
    return %c0_i32, %c0_i32_0 : i32, i32
  }
  func.func @transform_3(%arg0: i32) -> (i32, i32) {
    %c0_i32 = arith.constant 0 : i32
    %c0_i32_0 = arith.constant 0 : i32
    return %arg0, %c0_i32 : i32, i32
  }
  func.func @transform_4(%arg0: i32) -> (i32, i32) {
    %c0_i32 = arith.constant 0 : i32
    %c0_i32_0 = arith.constant 0 : i32
    %c0_i32_1 = arith.constant 0 : i32
    return %c0_i32, %c0_i32_0 : i32, i32
  }
  func.func @transform_5(%arg0: i32) -> (i32, i32) {
    %c0_i32 = arith.constant 0 : i32
    %c0_i32_0 = arith.constant 0 : i32
    %c0_i32_1 = arith.constant 0 : i32
    return %c0_i32, %c0_i32_0 : i32, i32
  }
  func.func @transform_6(%arg0: i32) -> (i32, i32) {
    %c0_i32 = arith.constant 0 : i32
    %c0_i32_0 = arith.constant 0 : i32
    return %arg0, %c0_i32 : i32, i32
  }
}

module attributes {stable_mosaic.version = 11 : i64} {
  func.func @_ffn_add_ln_kernel(%arg0: i32, %arg1: memref<16x32xbf16, #tpu.memory_space<vmem>>, %arg2: memref<32x64xbf16, #tpu.memory_space<vmem>>, %arg3: memref<1x64xf32, #tpu.memory_space<vmem>>, %arg4: memref<64x32xbf16, #tpu.memory_space<vmem>>, %arg5: memref<1x32xf32, #tpu.memory_space<vmem>>, %arg6: memref<1x32xf32, #tpu.memory_space<vmem>>, %arg7: memref<1x32xf32, #tpu.memory_space<vmem>>, %arg8: memref<16x32xbf16, #tpu.memory_space<vmem>>) attributes {dimension_semantics = [#tpu.dimension_semantics<parallel>], iteration_bounds = array<i64: 1>, scalar_prefetch = 0 : i64, scratch_operands = 0 : i64, tpu.core_type = #tpu.core_type<tc>, window_params = [{transform_indices = @transform_0, window_bounds = array<i64: 16, 32>}, {pipeline_mode = #tpu.pipeline_mode<synchronous>, transform_indices = @transform_1, window_bounds = array<i64: 32, 64>}, {pipeline_mode = #tpu.pipeline_mode<synchronous>, transform_indices = @transform_2, window_bounds = array<i64: 1, 64>}, {pipeline_mode = #tpu.pipeline_mode<synchronous>, transform_indices = @transform_3, window_bounds = array<i64: 64, 32>}, {pipeline_mode = #tpu.pipeline_mode<synchronous>, transform_indices = @transform_4, window_bounds = array<i64: 1, 32>}, {pipeline_mode = #tpu.pipeline_mode<synchronous>, transform_indices = @transform_5, window_bounds = array<i64: 1, 32>}, {pipeline_mode = #tpu.pipeline_mode<synchronous>, transform_indices = @transform_6, window_bounds = array<i64: 1, 32>}, {transform_indices = @transform_7, window_bounds = array<i64: 16, 32>}]} {
    %c0 = arith.constant 0 : index
    %c0_0 = arith.constant 0 : index
    %0 = vector.load %arg1[%c0, %c0_0] : memref<16x32xbf16, #tpu.memory_space<vmem>>, vector<16x32xbf16>
    %c0_1 = arith.constant 0 : index
    %c0_2 = arith.constant 0 : index
    %1 = vector.load %arg2[%c0_1, %c0_2] : memref<32x64xbf16, #tpu.memory_space<vmem>>, vector<32x64xbf16>
    %cst = arith.constant dense<0.000000e+00> : vector<16x64xf32>
    %2 = tpu.matmul %0, %1, %cst {dimension_numbers = #tpu.dot_dimension_numbers<[1], [0], [0], [1], [0, 0, 1, 1], [], []>} : vector<16x32xbf16>, vector<32x64xbf16>, vector<16x64xf32> -> vector<16x64xf32>
    %c0_3 = arith.constant 0 : index
    %c0_4 = arith.constant 0 : index
    %3 = vector.load %arg3[%c0_3, %c0_4] : memref<1x64xf32, #tpu.memory_space<vmem>>, vector<1x64xf32>
    %4 = vector.broadcast %3 : vector<1x64xf32> to vector<16x64xf32>
    %5 = arith.addf %2, %4 : vector<16x64xf32>
    %6 = arith.mulf %5, %5 : vector<16x64xf32>
    %7 = arith.mulf %5, %6 : vector<16x64xf32>
    %cst_5 = arith.constant 4.471500e-02 : f32
    %8 = vector.broadcast %cst_5 : f32 to vector<16x64xf32>
    %9 = arith.mulf %8, %7 : vector<16x64xf32>
    %10 = arith.addf %5, %9 : vector<16x64xf32>
    %cst_6 = arith.constant 0.797884583 : f32
    %11 = vector.broadcast %cst_6 : f32 to vector<16x64xf32>
    %12 = arith.mulf %11, %10 : vector<16x64xf32>
    %13 = math.tanh %12 : vector<16x64xf32>
    %cst_7 = arith.constant 1.000000e+00 : f32
    %14 = vector.broadcast %cst_7 : f32 to vector<16x64xf32>
    %15 = arith.addf %14, %13 : vector<16x64xf32>
    %cst_8 = arith.constant 5.000000e-01 : f32
    %16 = vector.broadcast %cst_8 : f32 to vector<16x64xf32>
    %17 = arith.mulf %16, %15 : vector<16x64xf32>
    %18 = arith.mulf %5, %17 : vector<16x64xf32>
    %19 = arith.truncf %18 : vector<16x64xf32> to vector<16x64xbf16>
    %c0_9 = arith.constant 0 : index
    %c0_10 = arith.constant 0 : index
    %20 = vector.load %arg4[%c0_9, %c0_10] : memref<64x32xbf16, #tpu.memory_space<vmem>>, vector<64x32xbf16>
    %cst_11 = arith.constant dense<0.000000e+00> : vector<16x32xf32>
    %21 = tpu.matmul %19, %20, %cst_11 {dimension_numbers = #tpu.dot_dimension_numbers<[1], [0], [0], [1], [0, 0, 1, 1], [], []>} : vector<16x64xbf16>, vector<64x32xbf16>, vector<16x32xf32> -> vector<16x32xf32>
    %c0_12 = arith.constant 0 : index
    %c0_13 = arith.constant 0 : index
    %22 = vector.load %arg5[%c0_12, %c0_13] : memref<1x32xf32, #tpu.memory_space<vmem>>, vector<1x32xf32>
    %23 = vector.broadcast %22 : vector<1x32xf32> to vector<16x32xf32>
    %24 = arith.addf %21, %23 : vector<16x32xf32>
    %25 = arith.extf %0 : vector<16x32xbf16> to vector<16x32xf32>
    %26 = arith.addf %24, %25 : vector<16x32xf32>
    %cst_14 = arith.constant dense<0.000000e+00> : vector<16xf32>
    %27 = vector.multi_reduction <add>, %26, %cst_14 [1] : vector<16x32xf32> to vector<16xf32>
    %28 = vector.shape_cast %27 : vector<16xf32> to vector<16x1xf32>
    %cst_15 = arith.constant 3.200000e+01 : f32
    %29 = vector.broadcast %cst_15 : f32 to vector<16x1xf32>
    %30 = arith.divf %28, %29 : vector<16x1xf32>
    %31 = vector.broadcast %30 : vector<16x1xf32> to vector<16x32xf32>
    %32 = arith.subf %26, %31 : vector<16x32xf32>
    %33 = arith.mulf %32, %32 : vector<16x32xf32>
    %cst_16 = arith.constant dense<0.000000e+00> : vector<16xf32>
    %34 = vector.multi_reduction <add>, %33, %cst_16 [1] : vector<16x32xf32> to vector<16xf32>
    %35 = vector.shape_cast %34 : vector<16xf32> to vector<16x1xf32>
    %cst_17 = arith.constant 3.200000e+01 : f32
    %36 = vector.broadcast %cst_17 : f32 to vector<16x1xf32>
    %37 = arith.divf %35, %36 : vector<16x1xf32>
    %38 = vector.broadcast %30 : vector<16x1xf32> to vector<16x32xf32>
    %39 = arith.subf %26, %38 : vector<16x32xf32>
    %cst_18 = arith.constant 9.99999997E-7 : f32
    %40 = vector.broadcast %cst_18 : f32 to vector<16x1xf32>
    %41 = arith.addf %37, %40 : vector<16x1xf32>
    %42 = math.rsqrt %41 : vector<16x1xf32>
    %43 = vector.broadcast %42 : vector<16x1xf32> to vector<16x32xf32>
    %44 = arith.mulf %39, %43 : vector<16x32xf32>
    %c0_19 = arith.constant 0 : index
    %c0_20 = arith.constant 0 : index
    %45 = vector.load %arg6[%c0_19, %c0_20] : memref<1x32xf32, #tpu.memory_space<vmem>>, vector<1x32xf32>
    %46 = vector.broadcast %45 : vector<1x32xf32> to vector<16x32xf32>
    %47 = arith.mulf %44, %46 : vector<16x32xf32>
    %c0_21 = arith.constant 0 : index
    %c0_22 = arith.constant 0 : index
    %48 = vector.load %arg7[%c0_21, %c0_22] : memref<1x32xf32, #tpu.memory_space<vmem>>, vector<1x32xf32>
    %49 = vector.broadcast %48 : vector<1x32xf32> to vector<16x32xf32>
    %50 = arith.addf %47, %49 : vector<16x32xf32>
    %51 = arith.truncf %50 : vector<16x32xf32> to vector<16x32xbf16>
    %c0_23 = arith.constant 0 : index
    %c0_24 = arith.constant 0 : index
    %52 = vector.load %arg8[%c0_23, %c0_24] : memref<16x32xbf16, #tpu.memory_space<vmem>>, vector<16x32xbf16>
    tpu.vector_store %arg8[%c0_23, %c0_24], %51 {strides = array<i32>} : memref<16x32xbf16, #tpu.memory_space<vmem>>, vector<16x32xbf16>,
    return
  }
  func.func @transform_0(%arg0: i32) -> (i32, i32) {
    %c0_i32 = arith.constant 0 : i32
    %c0_i32_0 = arith.constant 0 : i32
    return %arg0, %c0_i32 : i32, i32
  }
  func.func @transform_1(%arg0: i32) -> (i32, i32) {
    %c0_i32 = arith.constant 0 : i32
    %c0_i32_0 = arith.constant 0 : i32
    %c0_i32_1 = arith.constant 0 : i32
    return %c0_i32, %c0_i32_0 : i32, i32
  }
  func.func @transform_2(%arg0: i32) -> (i32, i32) {
    %c0_i32 = arith.constant 0 : i32
    %c0_i32_0 = arith.constant 0 : i32
    %c0_i32_1 = arith.constant 0 : i32
    return %c0_i32, %c0_i32_0 : i32, i32
  }
  func.func @transform_3(%arg0: i32) -> (i32, i32) {
    %c0_i32 = arith.constant 0 : i32
    %c0_i32_0 = arith.constant 0 : i32
    %c0_i32_1 = arith.constant 0 : i32
    return %c0_i32, %c0_i32_0 : i32, i32
  }
  func.func @transform_4(%arg0: i32) -> (i32, i32) {
    %c0_i32 = arith.constant 0 : i32
    %c0_i32_0 = arith.constant 0 : i32
    %c0_i32_1 = arith.constant 0 : i32
    return %c0_i32, %c0_i32_0 : i32, i32
  }
  func.func @transform_5(%arg0: i32) -> (i32, i32) {
    %c0_i32 = arith.constant 0 : i32
    %c0_i32_0 = arith.constant 0 : i32
    %c0_i32_1 = arith.constant 0 : i32
    return %c0_i32, %c0_i32_0 : i32, i32
  }
  func.func @transform_6(%arg0: i32) -> (i32, i32) {
    %c0_i32 = arith.constant 0 : i32
    %c0_i32_0 = arith.constant 0 : i32
    %c0_i32_1 = arith.constant 0 : i32
    return %c0_i32, %c0_i32_0 : i32, i32
  }
  func.func @transform_7(%arg0: i32) -> (i32, i32) {
    %c0_i32 = arith.constant 0 : i32
    %c0_i32_0 = arith.constant 0 : i32
    return %arg0, %c0_i32 : i32, i32
  }
}

</mosaic_0001>

<bundles_post_ra>
// kernel: bert_forward.9
= control target key start
LH: loop header
LB: loop body
LE: loop exit
PB: predicated region body
PF: predicated region fallthrough
CT: control target
= control target key end

     0   :  { %8 = vsyncpa [#allocation3], 0  ;;  %s336_s0 = inlined_call_operand.hbm [shape: bf16[16,32], index: 0, kind: input, shape index: {}]   ;;  %s337_s1 = inlined_call_operand.hbm [shape: f32[1,32], index: 1, kind: input, shape index: {}]   ;;  %s338_s2 = inlined_call_operand.hbm [shape: f32[1,32], index: 2, kind: input, shape index: {}]   ;;  %s339_s3 = inlined_call_operand.hbm [shape: bf16[16,32], index: 3, kind: output, shape index: {}]  }
   0x1   :  { %9 = vsyncpa [#allocation6], 0 }
   0x2   :  { %10 = vsyncpa [#allocation4], 0  ;;  %s245_s12 = smov [#allocation5]   ;;  %s246_s14 = smov [#allocation2]  }
   0x3   :  { %s29_s13 = sshll.u32 %s245_s12, 4  ;;  %s16_s15 = sshll.u32 %s246_s14, 4  ;;  %s30_s13 = int_to_ptr.vmem [resolvable:$true] %s29_s13  ;;  %s271_s15 = int_to_ptr.vmem [resolvable:$true] %s16_s15 }
   0x4   :  { %s151_s18 = scalar_lea.hbm %s337_s1, 16 }
   0x5   :  { %p152_p0 = scmp.ne.s32.totalorder %s337_s1, %s151_s18  ;;  %p155_p1 = scmp.lt.u32.totalorder %s151_s18, %s337_s1 }
   0x7   :  { %p157_p2 = pnand %p155_p1, %p152_p0 }
   0x9   :  { %160 = shalt.err (!%p157_p2)
}
   0xa   :  { %s161_s23 = scalar_lea.vmem %s30_s13, 16  ;;  %s165_s24 = scalar_lea.vmem %s30_s13, 32 }
   0xb   :  { %p162_p3 = scmp.ne.s32.totalorder %s30_s13, %s161_s23  ;;  %p166_p4 = scmp.lt.s32.totalorder %s30_s13, %s30_s13 }
   0xc   :  { %p167_p5 = scmp.lt.s32.totalorder %s165_s24, %s161_s23 }
   0xe   :  { %p168_p6 = por %p167_p5, %p166_p4 }
  0x10   :  { %p169_p7 = pnand %p168_p6, %p162_p3 }
  0x12   :  { %172 = shalt.err (!%p169_p7)
}
  0x13   :  { %32 = dma.hbm_to_vmem [thread:$0]  %s337_s1, 16, %s30_s13, [#allocation6]  }
  0x14   :  { %s173_s29 = scalar_lea.hbm %s336_s0, 128 }
  0x15   :  { %p174_p8 = scmp.ne.s32.totalorder %s336_s0, %s173_s29  ;;  %p177_p9 = scmp.lt.u32.totalorder %s173_s29, %s336_s0 }
  0x17   :  { %p179_p10 = pnand %p177_p9, %p174_p8 }
  0x19   :  { %182 = shalt.err (!%p179_p10)
}
  0x1a   :  { %s183_s7 = scalar_lea.vmem %s271_s15, 128  ;;  %p188_p12 = scmp.lt.s32.totalorder %s271_s15, %s271_s15 }
  0x1b   :  { %p184_p11 = scmp.ne.s32.totalorder %s271_s15, %s183_s7  ;;  %p189_p13 = scmp.lt.s32.totalorder %s183_s7, %s183_s7 }
  0x1d   :  { %p190_p0 = por %p189_p13, %p188_p12 }
  0x1f   :  { %p191_p1 = pnand %p190_p0, %p184_p11 }
  0x21   :  { %194 = shalt.err (!%p191_p1)
}
  0x22   :  { %s247_s1 = smov 64   ;;  %s248_s8 = smov 4  }
  0x23   :  { %22 = dma.hbm_to_vmem [thread:$0]  %s336_s0, 128, %s271_s15, [#allocation3], %s247_s1, %s247_s1, %s248_s8  }
  0x24   :  { %s249_s11 = smov [#allocation7]   ;;  %s195_s16 = scalar_lea.hbm %s338_s2, 16 }
  0x25   :  { %s39_s12 = sshll.u32 %s249_s11, 4  ;;  %p196_p2 = scmp.ne.s32.totalorder %s338_s2, %s195_s16  ;;  %s40_s12 = int_to_ptr.vmem [resolvable:$true] %s39_s12 }
  0x26   :  { %p199_p3 = scmp.lt.u32.totalorder %s195_s16, %s338_s2 }
  0x28   :  { %p201_p4 = pnand %p199_p3, %p196_p2 }
  0x2a   :  { %204 = shalt.err (!%p201_p4)
}
  0x2b   :  { %s205_s21 = scalar_lea.vmem %s40_s12, 16  ;;  %s209_s0 = scalar_lea.vmem %s40_s12, 32 }
  0x2c   :  { %p206_p5 = scmp.ne.s32.totalorder %s40_s12, %s205_s21  ;;  %p210_p6 = scmp.lt.s32.totalorder %s40_s12, %s40_s12 }
  0x2d   :  { %p211_p7 = scmp.lt.s32.totalorder %s209_s0, %s205_s21 }
  0x2f   :  { %p212_p8 = por %p211_p7, %p210_p6 }
  0x31   :  { %p213_p9 = pnand %p212_p8, %p206_p5 }
  0x33   :  { %216 = shalt.err (!%p213_p9)
}
  0x34   :  { %42 = dma.hbm_to_vmem [thread:$0]  %s338_s2, 16, %s40_s12, [#allocation6]  }
  0x35   :  { %239 = dma.done.wait [#allocation3], 128  }
  0x36   :  { %240 = vsyncadd [#allocation3], 4294967168 }
  0x37   :  { %241 = dma.done.wait [#allocation6], 32  }
  0x38   :  { %242 = vsyncadd [#allocation6], 4294967264  ;;  %v138_v0 = vld [vmem:[#allocation2] sm:$0xff]   ;;  %vm56_vm0 = vcmask 261120   ;;  %v131_v22 = vld [vmem:[#allocation5] ss:$0 sm:$0xff] }
  0x39   :  { %v139_v1 = vunpack.c.l.bf16 %v138_v0  ;;  %v140_v2 = vunpack.c.h.bf16 %v138_v0  ;;  %v132_v24 = vld [vmem:[#allocation7] ss:$0 sm:$0xff]  ;;  %vm110_vm1 = vcmask 257024   ;;  %s250_s2 = smov [#allocation8]  }
  0x3a   :  { %s118_s23 = sshll.u32 %s250_s2, 4  ;;  %s119_s23 = int_to_ptr.vmem [resolvable:$true] %s118_s23 }
  0x3b   :  { %v57_v3 = vsel %vm56_vm0, %v139_v1, 0.0  ;;  %v60_v4 = vsel %vm56_vm0, %v140_v2, 0.0  ;;  %s217_s24 = scalar_lea.vmem %s119_s23, 128  ;;  %p222_p11 = scmp.lt.s32.totalorder %s119_s23, %s119_s23 }
  0x3c   :  { %58 = vadd.xlane.f32.xlu0 %v57_v3  ;;  %p218_p10 = scmp.ne.s32.totalorder %s119_s23, %s217_s24  ;;  %p223_p12 = scmp.lt.s32.totalorder %s217_s24, %s217_s24 }
  0x3e   :  { %p224_p13 = por %p223_p12, %p222_p11 }
  0x40   :  { %61 = vadd.xlane.f32.xlu0 %v60_v4  ;;  %p225_p0 = pnand %p224_p13, %p218_p10 }
  0xc9   :  { %v59_v5 = vpop.xlane.xlu0 %58 }
  0xca   :  { %v64_v6 = vmul.f32 0.03125, %v59_v5 }
  0xcc   :  { %v66_v7 = vsub.f32 %v139_v1, %v64_v6 }
  0xcd   :  { %v62_v8 = vpop.xlane.xlu0 %61 }
  0xce   :  { %v65_v9 = vmul.f32 0.03125, %v62_v8  ;;  %v68_v10 = vmul.f32 %v66_v7, %v66_v7 }
  0xd0   :  { %v67_v11 = vsub.f32 %v140_v2, %v65_v9  ;;  %v70_v12 = vsel %vm56_vm0, %v68_v10, 0.0 }
  0xd1   :  { %71 = vadd.xlane.f32.xlu1 %v70_v12 }
  0xd2   :  { %v69_v13 = vmul.f32 %v67_v11, %v67_v11 }
  0xd4   :  { %v73_v14 = vsel %vm56_vm0, %v69_v13, 0.0 }
  0xd5   :  { %74 = vadd.xlane.f32.xlu1 %v73_v14 }
 0x15e   :  { %v72_v15 = vpop.xlane.xlu1 %71 }
 0x15f   :  { %v76_v16 = vmul.f32 0.03125, %v72_v15 }
 0x161   :  { %v78_v17 = vadd.f32 1e-06, %v76_v16 }
 0x162   :  { %v75_v18 = vpop.xlane.xlu1 %74 }
 0x163   :  { %147 = vrsqrt.f32 %v78_v17  ;;  %v77_v19 = vmul.f32 0.03125, %v75_v18 }
 0x165   :  { %v79_v20 = vadd.f32 1e-06, %v77_v19 }
 0x167   :  { %149 = vrsqrt.f32 %v79_v20 }
 0x16d   :  { %v148_v21 = vpop.eup %147 }
 0x16e   :  { %v82_v23 = vmul.f32 %v148_v21, %v66_v7 }
 0x170   :  { %v91_v25 = vmul.f32 %v131_v22, %v82_v23 }
 0x171   :  { %v150_v26 = vpop.eup %149 }
 0x172   :  { %v83_v27 = vmul.f32 %v150_v26, %v67_v11  ;;  %v100_v28 = vadd.f32 %v132_v24, %v91_v25 }
 0x174   :  { %v92_v29 = vmul.f32 %v131_v22, %v83_v27  ;;  %v135_v30 = vpack.c.bf16 %v100_v28, %v100_v28 }
 0x176   :  { %v101_v31 = vadd.f32 %v132_v24, %v92_v29  ;;  %111 = vst.msk [vmem:[#allocation8] sm:$0xf] %vm110_vm1, %v135_v30 }
 0x178   :  { %v136_v32 = vpack.c.bf16 %v101_v31, %v101_v31 }
 0x17a   :  { %112 = vst.msk [vmem:[#allocation8 + $0x4] sm:$0xf] %vm110_vm1, %v136_v32 }
 0x17b   :  { %228 = shalt.err (!%p225_p0)
}
 0x17c   :  { %s229_s27 = scalar_lea.hbm %s339_s3, 128 }
 0x17d   :  { %p230_p1 = scmp.ne.s32.totalorder %s339_s3, %s229_s27  ;;  %p233_p2 = scmp.lt.u32.totalorder %s229_s27, %s339_s3 }
 0x17f   :  { %p235_p3 = pnand %p233_p2, %p230_p1 }
 0x181   :  { %238 = shalt.err (!%p235_p3)
}
 0x182   :  { %124 = dma.vmem_to_hbm [thread:$0]  %s119_s23, 128, %s339_s3, [#allocation4], %s247_s1, %s247_s1, %s248_s8  }
 0x183   :  { %243 = dma.done.wait [#allocation4], 128  }
 0x184   :  { %244 = vsyncadd [#allocation4], 4294967168 }
 0x185   :  { %128 = vsyncpa [#allocation3], 1 }
 0x186   :  { %129 = vsyncpa [#allocation6], 1 }
 0x187   :  { %130 = vsyncpa [#allocation4], 1 }

// kernel: bert_forward.10
= control target key start
LH: loop header
LB: loop body
LE: loop exit
PB: predicated region body
PF: predicated region fallthrough
CT: control target
= control target key end

     0   :  { %8 = vsyncpa [#allocation3], 0  ;;  %s376_s0 = inlined_call_operand.hbm [shape: bf16[16,32], index: 0, kind: input, shape index: {}]   ;;  %s377_s1 = inlined_call_operand.hbm [shape: bf16[32,96], index: 1, kind: input, shape index: {}]   ;;  %s378_s2 = inlined_call_operand.hbm [shape: f32[1,96], index: 2, kind: input, shape index: {}]   ;;  %s379_s3 = inlined_call_operand.hbm [shape: bf16[16,96], index: 3, kind: output, shape index: {}]  }
   0x1   :  { %9 = vsyncpa [#allocation6], 0 }
   0x2   :  { %10 = vsyncpa [#allocation4], 0  ;;  %s284_s12 = smov [#allocation5]   ;;  %s285_s14 = smov [#allocation2]  }
   0x3   :  { %s28_s13 = sshll.u32 %s284_s12, 4  ;;  %s16_s15 = sshll.u32 %s285_s14, 4  ;;  %s29_s13 = int_to_ptr.vmem [resolvable:$true] %s28_s13  ;;  %s312_s15 = int_to_ptr.vmem [resolvable:$true] %s16_s15 }
   0x4   :  { %s190_s18 = scalar_lea.hbm %s377_s1, 256 }
   0x5   :  { %p191_p0 = scmp.ne.s32.totalorder %s377_s1, %s190_s18  ;;  %p194_p1 = scmp.lt.u32.totalorder %s190_s18, %s377_s1 }
   0x7   :  { %p196_p2 = pnand %p194_p1, %p191_p0 }
   0x9   :  { %199 = shalt.err (!%p196_p2)
}
   0xa   :  { %s200_s23 = scalar_lea.vmem %s29_s13, 256  ;;  %p205_p4 = scmp.lt.s32.totalorder %s29_s13, %s29_s13 }
   0xb   :  { %p201_p3 = scmp.ne.s32.totalorder %s29_s13, %s200_s23  ;;  %p206_p5 = scmp.lt.s32.totalorder %s200_s23, %s200_s23 }
   0xd   :  { %p207_p6 = por %p206_p5, %p205_p4 }
   0xf   :  { %p208_p7 = pnand %p207_p6, %p201_p3 }
  0x11   :  { %211 = shalt.err (!%p208_p7)
}
  0x12   :  { %s286_s24 = smov 64   ;;  %s287_s25 = smov 4  }
  0x13   :  { %34 = dma.hbm_to_vmem [thread:$0]  %s377_s1, 256, %s29_s13, [#allocation6], %s286_s24, %s286_s24, %s287_s25  }
  0x14   :  { %s212_s30 = scalar_lea.hbm %s376_s0, 128 }
  0x15   :  { %p213_p8 = scmp.ne.s32.totalorder %s376_s0, %s212_s30  ;;  %p216_p9 = scmp.lt.u32.totalorder %s212_s30, %s376_s0 }
  0x17   :  { %p218_p10 = pnand %p216_p9, %p213_p8 }
  0x19   :  { %221 = shalt.err (!%p218_p10)
}
  0x1a   :  { %s222_s8 = scalar_lea.vmem %s312_s15, 128  ;;  %p227_p12 = scmp.lt.s32.totalorder %s312_s15, %s312_s15 }
  0x1b   :  { %p223_p11 = scmp.ne.s32.totalorder %s312_s15, %s222_s8  ;;  %p228_p13 = scmp.lt.s32.totalorder %s222_s8, %s222_s8 }
  0x1d   :  { %p229_p0 = por %p228_p13, %p227_p12 }
  0x1f   :  { %p230_p1 = pnand %p229_p0, %p223_p11 }
  0x21   :  { %233 = shalt.err (!%p230_p1)
}
  0x22   :  { %22 = dma.hbm_to_vmem [thread:$0]  %s376_s0, 128, %s312_s15, [#allocation3], %s286_s24, %s286_s24, %s287_s25  }
  0x23   :  { %s288_s10 = smov [#allocation7]   ;;  %s234_s14 = scalar_lea.hbm %s378_s2, 16 }
  0x24   :  { %s41_s11 = sshll.u32 %s288_s10, 4  ;;  %p235_p2 = scmp.ne.s32.totalorder %s378_s2, %s234_s14  ;;  %s42_s11 = int_to_ptr.vmem [resolvable:$true] %s41_s11 }
  0x25   :  { %p238_p3 = scmp.lt.u32.totalorder %s234_s14, %s378_s2 }
  0x27   :  { %p240_p4 = pnand %p238_p3, %p235_p2 }
  0x29   :  { %243 = shalt.err (!%p240_p4)
}
  0x2a   :  { %s244_s20 = scalar_lea.vmem %s42_s11, 16  ;;  %s248_s0 = scalar_lea.vmem %s42_s11, 32 }
  0x2b   :  { %p245_p5 = scmp.ne.s32.totalorder %s42_s11, %s244_s20  ;;  %p249_p6 = scmp.lt.s32.totalorder %s42_s11, %s42_s11 }
  0x2c   :  { %p250_p7 = scmp.lt.s32.totalorder %s248_s0, %s244_s20 }
  0x2e   :  { %p251_p8 = por %p250_p7, %p249_p6 }
  0x30   :  { %p252_p9 = pnand %p251_p8, %p245_p5 }
  0x32   :  { %255 = shalt.err (!%p252_p9)
}
  0x33   :  { %44 = dma.hbm_to_vmem [thread:$0]  %s378_s2, 16, %s42_s11, [#allocation6]  }
  0x34   :  { %278 = dma.done.wait [#allocation3], 128  }
  0x35   :  { %279 = vsyncadd [#allocation3], 4294967168 }
  0x36   :  { %280 = dma.done.wait [#allocation6], 272  }
  0x37   :  { %281 = vsyncadd [#allocation6], 4294967024  ;;  %v289_v0 = vmov 0.0   ;;  %vm290_vm0 = vmmov 0   ;;  %v187_v1 = vld [vmem:[#allocation5] sm:$0xff]   ;;  %v188_v2 = vld [vmem:[#allocation5 + $0x8] sm:$0xff]  }
  0x38   :  { %171 = vmatprep.subr.bf16.mxu0 %v289_v0  ;;  %175 = vmatprep.mubr.msk.bf16.mxu0 %vm290_vm0, %v289_v0  ;;  %v189_v3 = vld [vmem:[#allocation2] sm:$0xff]   ;;  %vm85_vm1 = vcmask 261120   ;;  %v159_v4 = vld [vmem:[#allocation7] ss:$0 sm:$0xff]  ;;  %vm138_vm2 = vcmask 781312   ;;  %s291_s2 = smov [#allocation8]  }
  0x39   :  { %172 = vmatpush3.bf16.msra.mxu0 %v187_v1  ;;  %s146_s22 = sshll.u32 %s291_s2, 4  ;;  %s147_s22 = int_to_ptr.vmem [resolvable:$true] %s146_s22 }
  0x3a   :  { %173 = vmatprep.subr.bf16.mxu0 %v289_v0  ;;  %s256_s23 = scalar_lea.vmem %s147_s22, 128  ;;  %p261_p11 = scmp.lt.s32.totalorder %s147_s22, %s147_s22 }
  0x3b   :  { %p257_p10 = scmp.ne.s32.totalorder %s147_s22, %s256_s23  ;;  %p262_p12 = scmp.lt.s32.totalorder %s256_s23, %s256_s23 }
  0x3d   :  { %174 = vmatpush3.bf16.msra.mxu0 %v188_v2  ;;  %p263_p13 = por %p262_p12, %p261_p11 }
  0x3f   :  { %p264_p0 = pnand %p263_p13, %p257_p10 }
  0x40   :  { %176 = vmatmul.mubr.msk.bf16.vlgmr.msra.gmra.mrb[0].mxu0 %vm85_vm1, %v189_v3 }
 0x113   :  { %v123_v5 = vpop.f32.mrb[0].mxu0 }
 0x114   :  { %v124_v6 = vadd.f32 %v159_v4, %v123_v5  ;;  %v177_v7 = vpop.f32.mrb[1].mxu0 }
 0x115   :  { %v126_v8 = vpop.f32.mrb[2].mxu0 }
 0x116   :  { %v166_v9 = vpack.c.bf16 %v124_v6, %v124_v6  ;;  %v127_v10 = vadd.f32 %v159_v4, %v126_v8  ;;  %v178_v11 = vpop.f32.mrb[3].mxu0 }
 0x118   :  { %v167_v12 = vpack.c.bf16 %v127_v10, %v127_v10  ;;  %139 = vst.msk [vmem:[#allocation8] sm:$0xf] %vm138_vm2, %v166_v9 }
 0x11a   :  { %140 = vst.msk [vmem:[#allocation8 + $0x4] sm:$0xf] %vm138_vm2, %v167_v12 }
 0x11b   :  { %267 = shalt.err (!%p264_p0)
}
 0x11c   :  { %s268_s28 = scalar_lea.hbm %s379_s3, 128 }
 0x11d   :  { %p269_p1 = scmp.ne.s32.totalorder %s379_s3, %s268_s28  ;;  %p272_p2 = scmp.lt.u32.totalorder %s268_s28, %s379_s3 }
 0x11f   :  { %p274_p3 = pnand %p272_p2, %p269_p1 }
 0x121   :  { %277 = shalt.err (!%p274_p3)
}
 0x122   :  { %152 = dma.vmem_to_hbm [thread:$0]  %s147_s22, 128, %s379_s3, [#allocation4], %s286_s24, %s286_s24, %s287_s25  }
 0x123   :  { %282 = dma.done.wait [#allocation4], 128  }
 0x124   :  { %283 = vsyncadd [#allocation4], 4294967168 }
 0x125   :  { %156 = vsyncpa [#allocation3], 1 }
 0x126   :  { %157 = vsyncpa [#allocation6], 1 }
 0x127   :  { %158 = vsyncpa [#allocation4], 1 }

// kernel: bert_forward.12
= control target key start
LH: loop header
LB: loop body
LE: loop exit
PB: predicated region body
PF: predicated region fallthrough
CT: control target
= control target key end

     0   :  { %11 = vsyncpa [#allocation3], 0  ;;  %s620_s0 = inlined_call_operand.hbm [shape: bf16[16,32], index: 0, kind: input, shape index: {}]   ;;  %s621_s1 = inlined_call_operand.hbm [shape: bf16[32,32], index: 1, kind: input, shape index: {}]   ;;  %s622_s2 = inlined_call_operand.hbm [shape: f32[1,32], index: 2, kind: input, shape index: {}]   ;;  %s623_s3 = inlined_call_operand.hbm [shape: bf16[16,32], index: 3, kind: input, shape index: {}]   ;;  %s624_s4 = inlined_call_operand.hbm [shape: f32[1,32], index: 4, kind: input, shape index: {}]   ;;  %s625_s5 = inlined_call_operand.hbm [shape: f32[1,32], index: 5, kind: input, shape index: {}]   ;;  %s626_s6 = inlined_call_operand.hbm [shape: bf16[16,32], index: 6, kind: output, shape index: {}]  }
   0x1   :  { %12 = vsyncpa [#allocation6], 0 }
   0x2   :  { %13 = vsyncpa [#allocation9], 0 }
   0x3   :  { %14 = vsyncpa [#allocation12], 0 }
   0x4   :  { %15 = vsyncpa [#allocation4], 0  ;;  %s466_s21 = smov [#allocation5]   ;;  %s467_s23 = smov [#allocation8]  }
   0x5   :  { %s33_s22 = sshll.u32 %s466_s21, 4  ;;  %s55_s24 = sshll.u32 %s467_s23, 4  ;;  %s34_s22 = int_to_ptr.vmem [resolvable:$true] %s33_s22  ;;  %s512_s24 = int_to_ptr.vmem [resolvable:$true] %s55_s24 }
   0x6   :  { %s302_s27 = scalar_lea.hbm %s621_s1, 256 }
   0x7   :  { %p303_p0 = scmp.ne.s32.totalorder %s621_s1, %s302_s27  ;;  %p306_p1 = scmp.lt.u32.totalorder %s302_s27, %s621_s1 }
   0x9   :  { %p308_p2 = pnand %p306_p1, %p303_p0 }
   0xb   :  { %311 = shalt.err (!%p308_p2)
}
   0xc   :  { %s312_s8 = scalar_lea.vmem %s34_s22, 256  ;;  %p317_p4 = scmp.lt.s32.totalorder %s34_s22, %s34_s22 }
   0xd   :  { %p313_p3 = scmp.ne.s32.totalorder %s34_s22, %s312_s8  ;;  %p318_p5 = scmp.lt.s32.totalorder %s312_s8, %s312_s8 }
   0xf   :  { %p319_p6 = por %p318_p5, %p317_p4 }
  0x11   :  { %p320_p7 = pnand %p319_p6, %p313_p3 }
  0x13   :  { %323 = shalt.err (!%p320_p7)
}
  0x14   :  { %s468_s9 = smov 64   ;;  %s469_s10 = smov 4  }
  0x15   :  { %39 = dma.hbm_to_vmem [thread:$0]  %s621_s1, 256, %s34_s22, [#allocation6], %s468_s9, %s468_s9, %s469_s10  }
  0x16   :  { %s324_s15 = scalar_lea.hbm %s623_s3, 128 }
  0x17   :  { %p325_p8 = scmp.ne.s32.totalorder %s623_s3, %s324_s15  ;;  %p328_p9 = scmp.lt.u32.totalorder %s324_s15, %s623_s3 }
  0x19   :  { %p330_p10 = pnand %p328_p9, %p325_p8 }
  0x1b   :  { %333 = shalt.err (!%p330_p10)
}
  0x1c   :  { %s334_s20 = scalar_lea.vmem %s512_s24, 128  ;;  %p339_p12 = scmp.lt.s32.totalorder %s512_s24, %s512_s24 }
  0x1d   :  { %p335_p11 = scmp.ne.s32.totalorder %s512_s24, %s334_s20  ;;  %p340_p13 = scmp.lt.s32.totalorder %s334_s20, %s334_s20 }
  0x1f   :  { %p341_p0 = por %p340_p13, %p339_p12 }
  0x21   :  { %p342_p1 = pnand %p341_p0, %p335_p11 }
  0x23   :  { %345 = shalt.err (!%p342_p1)
}
  0x24   :  { %61 = dma.hbm_to_vmem [thread:$0]  %s623_s3, 128, %s512_s24, [#allocation9], %s468_s9, %s468_s9, %s469_s10  }
  0x25   :  { %s470_s22 = smov [#allocation2]   ;;  %s471_s25 = smov [#allocation7]  }
  0x26   :  { %s21_s23 = sshll.u32 %s470_s22, 4  ;;  %s46_s26 = sshll.u32 %s471_s25, 4  ;;  %s22_s23 = int_to_ptr.vmem [resolvable:$true] %s21_s23  ;;  %s47_s26 = int_to_ptr.vmem [resolvable:$true] %s46_s26 }
  0x27   :  { %s346_s29 = scalar_lea.hbm %s620_s0, 128 }
  0x28   :  { %p347_p2 = scmp.ne.s32.totalorder %s620_s0, %s346_s29  ;;  %p350_p3 = scmp.lt.u32.totalorder %s346_s29, %s620_s0 }
  0x2a   :  { %p352_p4 = pnand %p350_p3, %p347_p2 }
  0x2c   :  { %355 = shalt.err (!%p352_p4)
}
  0x2d   :  { %s356_s3 = scalar_lea.vmem %s22_s23, 128  ;;  %p361_p6 = scmp.lt.s32.totalorder %s22_s23, %s22_s23 }
  0x2e   :  { %p357_p5 = scmp.ne.s32.totalorder %s22_s23, %s356_s3  ;;  %p362_p7 = scmp.lt.s32.totalorder %s356_s3, %s356_s3 }
  0x30   :  { %p363_p8 = por %p362_p7, %p361_p6 }
  0x32   :  { %p364_p9 = pnand %p363_p8, %p357_p5 }
  0x34   :  { %367 = shalt.err (!%p364_p9)
}
  0x35   :  { %27 = dma.hbm_to_vmem [thread:$0]  %s620_s0, 128, %s22_s23, [#allocation3], %s468_s9, %s468_s9, %s469_s10  }
  0x36   :  { %s368_s15 = scalar_lea.hbm %s622_s2, 16 }
  0x37   :  { %p369_p10 = scmp.ne.s32.totalorder %s622_s2, %s368_s15  ;;  %p372_p11 = scmp.lt.u32.totalorder %s368_s15, %s622_s2 }
  0x39   :  { %p374_p12 = pnand %p372_p11, %p369_p10 }
  0x3b   :  { %377 = shalt.err (!%p374_p12)
}
  0x3c   :  { %s378_s20 = scalar_lea.vmem %s47_s26, 16  ;;  %s382_s1 = scalar_lea.vmem %s47_s26, 32 }
  0x3d   :  { %p379_p13 = scmp.ne.s32.totalorder %s47_s26, %s378_s20  ;;  %p383_p0 = scmp.lt.s32.totalorder %s47_s26, %s47_s26 }
  0x3e   :  { %p384_p1 = scmp.lt.s32.totalorder %s382_s1, %s378_s20 }
  0x40   :  { %p385_p2 = por %p384_p1, %p383_p0 }
  0x42   :  { %p386_p3 = pnand %p385_p2, %p379_p13 }
  0x44   :  { %389 = shalt.err (!%p386_p3)
}
  0x45   :  { %49 = dma.hbm_to_vmem [thread:$0]  %s622_s2, 16, %s47_s26, [#allocation6]  }
  0x46   :  { %s472_s22 = smov [#allocation10]   ;;  %s473_s25 = smov [#allocation11]  }
  0x47   :  { %s68_s23 = sshll.u32 %s472_s22, 4  ;;  %s78_s27 = sshll.u32 %s473_s25, 4  ;;  %s69_s23 = int_to_ptr.vmem [resolvable:$true] %s68_s23  ;;  %s79_s27 = int_to_ptr.vmem [resolvable:$true] %s78_s27 }
  0x48   :  { %s390_s30 = scalar_lea.hbm %s624_s4, 16 }
  0x49   :  { %p391_p4 = scmp.ne.s32.totalorder %s624_s4, %s390_s30  ;;  %p394_p5 = scmp.lt.u32.totalorder %s390_s30, %s624_s4 }
  0x4b   :  { %p396_p6 = pnand %p394_p5, %p391_p4 }
  0x4d   :  { %399 = shalt.err (!%p396_p6)
}
  0x4e   :  { %s400_s2 = scalar_lea.vmem %s69_s23, 16  ;;  %s404_s26 = scalar_lea.vmem %s69_s23, 32 }
  0x4f   :  { %p401_p7 = scmp.ne.s32.totalorder %s69_s23, %s400_s2  ;;  %p405_p8 = scmp.lt.s32.totalorder %s69_s23, %s69_s23 }
  0x50   :  { %p406_p9 = scmp.lt.s32.totalorder %s404_s26, %s400_s2 }
  0x52   :  { %p407_p10 = por %p406_p9, %p405_p8 }
  0x54   :  { %p408_p11 = pnand %p407_p10, %p401_p7 }
  0x56   :  { %411 = shalt.err (!%p408_p11)
}
  0x57   :  { %71 = dma.hbm_to_vmem [thread:$0]  %s624_s4, 16, %s69_s23, [#allocation9]  }
  0x58   :  { %s412_s15 = scalar_lea.hbm %s625_s5, 16 }
  0x59   :  { %p413_p12 = scmp.ne.s32.totalorder %s625_s5, %s412_s15  ;;  %p416_p13 = scmp.lt.u32.totalorder %s412_s15, %s625_s5 }
  0x5b   :  { %p418_p0 = pnand %p416_p13, %p413_p12 }
  0x5d   :  { %421 = shalt.err (!%p418_p0)
}
  0x5e   :  { %s422_s20 = scalar_lea.vmem %s79_s27, 16  ;;  %s426_s1 = scalar_lea.vmem %s79_s27, 32 }
  0x5f   :  { %p423_p1 = scmp.ne.s32.totalorder %s79_s27, %s422_s20  ;;  %p427_p2 = scmp.lt.s32.totalorder %s79_s27, %s79_s27 }
  0x60   :  { %p428_p3 = scmp.lt.s32.totalorder %s426_s1, %s422_s20 }
  0x62   :  { %p429_p4 = por %p428_p3, %p427_p2 }
  0x64   :  { %p430_p5 = pnand %p429_p4, %p423_p1 }
  0x66   :  { %433 = shalt.err (!%p430_p5)
}
  0x67   :  { %81 = dma.hbm_to_vmem [thread:$0]  %s625_s5, 16, %s79_s27, [#allocation12]  }
  0x68   :  { %456 = dma.done.wait [#allocation3], 128  }
  0x69   :  { %457 = vsyncadd [#allocation3], 4294967168 }
  0x6a   :  { %458 = dma.done.wait [#allocation6], 272  }
  0x6b   :  { %459 = vsyncadd [#allocation6], 4294967024 }
  0x6c   :  { %460 = dma.done.wait [#allocation9], 144  }
  0x6d   :  { %461 = vsyncadd [#allocation9], 4294967152 }
  0x6e   :  { %462 = dma.done.wait [#allocation12], 16  }
  0x6f   :  { %463 = vsyncadd [#allocation12], 4294967280  ;;  %v474_v0 = vmov 0.0   ;;  %vm475_vm0 = vmmov 0   ;;  %v295_v1 = vld [vmem:[#allocation5] sm:$0xff]   ;;  %v296_v2 = vld [vmem:[#allocation5 + $0x8] sm:$0xff]  }
  0x70   :  { %276 = vmatprep.subr.bf16.mxu0 %v474_v0  ;;  %280 = vmatprep.mubr.msk.bf16.mxu0 %vm475_vm0, %v474_v0  ;;  %v297_v3 = vld [vmem:[#allocation2] sm:$0xff]   ;;  %vm131_vm1 = vcmask 261120   ;;  %v258_v5 = vld [vmem:[#allocation7] ss:$0 sm:$0xff]  ;;  %vm235_vm2 = vcmask 257024   ;;  %s476_s5 = smov [#allocation13]  }
  0x71   :  { %277 = vmatpush3.bf16.msra.mxu0 %v295_v1  ;;  %v270_v4 = vld [vmem:[#allocation8] sm:$0xff]   ;;  %v263_v35 = vld [vmem:[#allocation10] ss:$0 sm:$0xff]  ;;  %v264_v37 = vld [vmem:[#allocation11] ss:$0 sm:$0xff]  ;;  %s243_s21 = sshll.u32 %s476_s5, 4  ;;  %s244_s21 = int_to_ptr.vmem [resolvable:$true] %s243_s21 }
  0x72   :  { %278 = vmatprep.subr.bf16.mxu0 %v474_v0  ;;  %v271_v6 = vunpack.c.l.bf16 %v270_v4  ;;  %v272_v10 = vunpack.c.h.bf16 %v270_v4  ;;  %s434_s22 = scalar_lea.vmem %s244_s21, 128  ;;  %p439_p7 = scmp.lt.s32.totalorder %s244_s21, %s244_s21 }
  0x73   :  { %p435_p6 = scmp.ne.s32.totalorder %s244_s21, %s434_s22  ;;  %p440_p8 = scmp.lt.s32.totalorder %s434_s22, %s434_s22 }
  0x75   :  { %279 = vmatpush3.bf16.msra.mxu0 %v296_v2  ;;  %p441_p9 = por %p440_p8, %p439_p7 }
  0x77   :  { %p442_p10 = pnand %p441_p9, %p435_p6 }
  0x78   :  { %281 = vmatmul.mubr.msk.bf16.vlgmr.msra.gmra.mrb[0].mxu0 %vm131_vm1, %v297_v3 }
 0x14b   :  { %v169_v7 = vpop.f32.mrb[0].mxu0 }
 0x14c   :  { %v170_v8 = vadd.f32 %v258_v5, %v169_v7  ;;  %v282_v9 = vpop.f32.mrb[1].mxu0 }
 0x14d   :  { %v172_v11 = vpop.f32.mrb[2].mxu0 }
 0x14e   :  { %v173_v12 = vadd.f32 %v258_v5, %v172_v11  ;;  %v283_v13 = vpop.f32.mrb[3].mxu0  ;;  %v180_v14 = vadd.f32 %v271_v6, %v170_v8 }
 0x150   :  { %v182_v15 = vsel %vm131_vm1, %v180_v14, 0.0  ;;  %v181_v16 = vadd.f32 %v272_v10, %v173_v12 }
 0x151   :  { %183 = vadd.xlane.f32.xlu0 %v182_v15 }
 0x152   :  { %v185_v17 = vsel %vm131_vm1, %v181_v16, 0.0 }
 0x155   :  { %186 = vadd.xlane.f32.xlu0 %v185_v17 }
 0x1de   :  { %v184_v18 = vpop.xlane.xlu0 %183 }
 0x1df   :  { %v189_v19 = vmul.f32 0.03125, %v184_v18 }
 0x1e1   :  { %v191_v20 = vsub.f32 %v180_v14, %v189_v19 }
 0x1e2   :  { %v187_v21 = vpop.xlane.xlu0 %186 }
 0x1e3   :  { %v190_v22 = vmul.f32 0.03125, %v187_v21  ;;  %v193_v23 = vmul.f32 %v191_v20, %v191_v20 }
 0x1e5   :  { %v192_v24 = vsub.f32 %v181_v16, %v190_v22  ;;  %v195_v25 = vsel %vm131_vm1, %v193_v23, 0.0 }
 0x1e6   :  { %196 = vadd.xlane.f32.xlu1 %v195_v25 }
 0x1e7   :  { %v194_v26 = vmul.f32 %v192_v24, %v192_v24 }
 0x1e9   :  { %v198_v27 = vsel %vm131_vm1, %v194_v26, 0.0 }
 0x1ea   :  { %199 = vadd.xlane.f32.xlu1 %v198_v27 }
 0x273   :  { %v197_v28 = vpop.xlane.xlu1 %196 }
 0x274   :  { %v201_v29 = vmul.f32 0.03125, %v197_v28 }
 0x276   :  { %v203_v30 = vadd.f32 1e-06, %v201_v29 }
 0x277   :  { %v200_v31 = vpop.xlane.xlu1 %199 }
 0x278   :  { %298 = vrsqrt.f32 %v203_v30  ;;  %v202_v32 = vmul.f32 0.03125, %v200_v31 }
 0x27a   :  { %v204_v33 = vadd.f32 1e-06, %v202_v32 }
 0x27c   :  { %300 = vrsqrt.f32 %v204_v33 }
 0x282   :  { %v299_v34 = vpop.eup %298 }
 0x283   :  { %v207_v36 = vmul.f32 %v299_v34, %v191_v20 }
 0x285   :  { %v216_v38 = vmul.f32 %v263_v35, %v207_v36 }
 0x286   :  { %v301_v39 = vpop.eup %300 }
 0x287   :  { %v208_v40 = vmul.f32 %v301_v39, %v192_v24  ;;  %v225_v41 = vadd.f32 %v264_v37, %v216_v38 }
 0x289   :  { %v217_v42 = vmul.f32 %v263_v35, %v208_v40  ;;  %v267_v43 = vpack.c.bf16 %v225_v41, %v225_v41 }
 0x28b   :  { %v226_v44 = vadd.f32 %v264_v37, %v217_v42  ;;  %236 = vst.msk [vmem:[#allocation13] sm:$0xf] %vm235_vm2, %v267_v43 }
 0x28d   :  { %v268_v45 = vpack.c.bf16 %v226_v44, %v226_v44 }
 0x28f   :  { %237 = vst.msk [vmem:[#allocation13 + $0x4] sm:$0xf] %vm235_vm2, %v268_v45 }
 0x290   :  { %445 = shalt.err (!%p442_p10)
}
 0x291   :  { %s446_s27 = scalar_lea.hbm %s626_s6, 128 }
 0x292   :  { %p447_p11 = scmp.ne.s32.totalorder %s626_s6, %s446_s27  ;;  %p450_p12 = scmp.lt.u32.totalorder %s446_s27, %s626_s6 }
 0x294   :  { %p452_p13 = pnand %p450_p12, %p447_p11 }
 0x296   :  { %455 = shalt.err (!%p452_p13)
}
 0x297   :  { %249 = dma.vmem_to_hbm [thread:$0]  %s244_s21, 128, %s626_s6, [#allocation4], %s468_s9, %s468_s9, %s469_s10  }
 0x298   :  { %464 = dma.done.wait [#allocation4], 128  }
 0x299   :  { %465 = vsyncadd [#allocation4], 4294967168 }
 0x29a   :  { %253 = vsyncpa [#allocation3], 1 }
 0x29b   :  { %254 = vsyncpa [#allocation6], 1 }
 0x29c   :  { %255 = vsyncpa [#allocation9], 1 }
 0x29d   :  { %256 = vsyncpa [#allocation12], 1 }
 0x29e   :  { %257 = vsyncpa [#allocation4], 1 }

// kernel: bert_forward.11
= control target key start
LH: loop header
LB: loop body
LE: loop exit
PB: predicated region body
PF: predicated region fallthrough
CT: control target
= control target key end

     0   :  { %s2071_s0 = inlined_call_operand.hbm [shape: bf16[16,96], index: 0, kind: input, shape index: {}]   ;;  %s2072_s1 = inlined_call_operand.hbm [shape: s32[2,8,1], index: 1, kind: input, shape index: {}]   ;;  %s2073_s2 = inlined_call_operand.hbm [shape: s32[2,1,8], index: 2, kind: input, shape index: {}]   ;;  %s2074_s3 = inlined_call_operand.hbm [shape: bf16[16,32], index: 3, kind: output, shape index: {}]  }
   0x1   :  { %2079 = sst [smem:[#allocation13_spill]] %s2072_s1 }
   0x2   :  { %8 = vsyncpa [#allocation3], 0 }
   0x3   :  { %10 = vsyncpa [#allocation3 + $0x1], 0 }
   0x4   :  { %11 = vsyncpa [#allocation6], 0 }
   0x5   :  { %13 = vsyncpa [#allocation6 + $0x1], 0 }
   0x6   :  { %14 = vsyncpa [#allocation4], 0 }
   0x7   :  { %16 = vsyncpa [#allocation4 + $0x1], 0  ;;  %s1722_s12 = smov 0   ;;  %s1724_s13 = smov 0  }
   0x8   :  { %s1726_s14 = smov 0   ;;  %s1728_s15 = smov 0  }
   0x9   :  { %s1730_s16 = smov 0   ;;  %s1732_s17 = smov 0  }
   0xa LB: > { %s1753_s18 = sadd.s32 4294967295, %s1683_s17   ;;  %s1309_s19 = sadd.s32 4294967294, %s1683_s17   ;;  %s1683_s17 = sphi %s1732_s17, %s22_s17   ;;  %s1679_s16 = sphi %s1730_s16, %s2104_s16   ;;  %s1675_s15 = sphi %s1728_s15, %s2103_s15   ;;  %s1671_s14 = sphi %s1726_s14, %s2102_s14   ;;  %s1667_s13 = sphi %s1724_s13, %s2101_s13   ;;  %s1663_s12 = sphi %s1722_s12, %s2100_s12  }
   0xb   : > { %s34_s20 = sadd.s32 1, %s1679_s16  ;;  %s43_s21 = sadd.s32 1, %s1671_s14 }
   0xc   : > { %p36_p0 = scmp.ge.s32.totalorder %s34_s20, 2  ;;  %p50_p1 = scmp.ne.s32.totalorder %s1671_s14, %s1667_s13 }
   0xd   : > { %p51_p2 = scmp.eq.s32.totalorder %s1683_s17, 0  ;;  %p56_p3 = scmp.ne.s32.totalorder %s1667_s13, %s1663_s12 }
   0xe   : > { %s2106_s20 = smov (%p36_p0, %s34_s20), 0  ;;  %p57_p5 = scmp.eq.s32.totalorder %s1753_s18, 0 }
   0xf   : > { %2080 = sst [smem:[#allocation12_spill]] %s2106_s20  ;;  %p1765_p4 = por %p51_p2, %p50_p1 }
  0x10   : > { %s38_s23 = ssub.s32 %s1679_s16, %s2106_s20  ;;  %p134_p6 = scmp.eq.s32.totalorder %s1753_s18, 1 }
  0x11   : > { %p41_p7 = scmp.eq.s32.totalorder %s38_s23, 0  ;;  %p1773_p8 = por %p57_p5, %p56_p3 }
  0x12   : > { %p1777_p9 = por %p134_p6, %p50_p1  ;;  %p140_p10 = scmp.eq.s32.totalorder %s1309_s19, 1 }
  0x13   : > { %s2082_s24 = scalar_select %p1773_p8, 1, 0 }
  0x14   : > { %s2083_s25 = scalar_select %p1777_p9, 1, 0 }
  0x15   : > { %s1782_s26 = scalar_select %p41_p7, %s1671_s14, %s43_s21  }
  0x16   : > { %p1784_p11 = por %p140_p10, %p56_p3  ;;  %p1425_p13 = scmp.lt.s32.totalorder %s1683_s17, 2 }
  0x17   : > { %s1791_s28 = sand.u32 1, %s1671_s14   ;;  %s179_s29 = sand.u32 1, %s1683_s17  }
  0x18   : > { %s2084_s27 = scalar_select %p1784_p11, 1, 0 }
  0x19   : > { %s1314_s30 = sshll.u32 %s1791_s28, 3  ;;  %p1797_p0 = pnand %p1425_p13, %p1765_p4 }
  0x1a   : > { %s1315_s5 = sshll.u32 %s1679_s16, 7  ;;  %s2086_s1 = sld [smem:[#allocation13_spill]] }
  0x1b   : > { %s2085_s4 = scalar_select %p1797_p0, 1, 0 }
  0x1c   : > { %s183_s9 = scalar_lea.vmem [#allocation5], %s1314_s30  ;;  %s1811_s11 = scalar_lea.sflag [#allocation6], %s179_s29 }
  0x1d   : > { %s190_s10 = sshll.u32 %s183_s9, 4  ;;  %p1817_p4 = pneg %p1797_p0  ;;  %s1808_s10 = int_to_ptr.vmem [resolvable:$true] %s190_s10 }
  0x20   : > { %s1805_s8 = scalar_lea.hbm %s2086_s1, %s1315_s5  ;;  %s1512_s30 = scalar_lea.hbm %s2086_s1, 256 }
  0x21   : > { %s1507_s19 = scalar_lea.hbm %s1805_s8, 128  ;;  %p1513_p7 = scmp.lt.u32.totalorder %s1805_s8, %s2086_s1 }
  0x22   : > { %p1508_p3 = scmp.ne.s32.totalorder %s1805_s8, %s1507_s19  ;;  %p1514_p10 = scmp.lt.u32.totalorder %s1512_s30, %s1507_s19 }
  0x23   : > { %p1516_p12 = scmp.lt.u32.totalorder %s1507_s19, %s1805_s8 }
  0x24   : > { %p1510_p5 = pnand %p1817_p4, %p1508_p3  ;;  %p1515_p13 = por %p1514_p10, %p1513_p7 }
  0x26   : > { %p1511_p6 = pneg %p1510_p5  ;;  %p1517_p1 = por %p1516_p12, %p1515_p13 }
  0x28   : > { %p1518_p2 = pnand %p1517_p1, %p1511_p6 }
  0x2a   : > { %1521 = shalt.err (!%p1518_p2)
}
  0x2b   : > { %s1522_s29 = scalar_lea.vmem %s1808_s10, 128  ;;  %s1685_s7 = smov [#allocation5]  }
  0x2c   : > { %p1523_p3 = scmp.ne.s32.totalorder %s1808_s10, %s1522_s29  ;;  %s1527_s9 = sshll.u32 %s1685_s7, 4  ;;  %s1528_s9 = int_to_ptr.vmem [resolvable:$false] %s1527_s9 }
  0x2d   : > { %s1529_s22 = scalar_lea.vmem %s1528_s9, 256  ;;  %p1530_p9 = scmp.lt.s32.totalorder %s1808_s10, %s1528_s9 }
  0x2e   : > { %p1525_p5 = pnand %p1523_p3, %p1817_p4  ;;  %p1531_p8 = scmp.lt.s32.totalorder %s1529_s22, %s1522_s29 }
  0x30   : > { %p1526_p11 = pneg %p1525_p5  ;;  %p1532_p7 = por %p1531_p8, %p1530_p9 }
  0x32   : > { %p1533_p10 = pnand %p1532_p7, %p1526_p11 }
  0x34   : > { %1536 = shalt.err (!%p1533_p10)
}
  0x35   : > { %1417 = dma.hbm_to_vmem [thread:$0]  (!%p1797_p0), %s1805_s8, 128, %s1808_s10, %s1811_s11  }
  0x36   : > { %p2088_p12 = scmp.lt.s32.totalorder %s1683_s17, 3  ;;  %p2089_p1 = scmp.ge.s32.totalorder %s1683_s17, 1 }
  0x37   : > { %s1312_s23 = sshll.u32 %s1791_s28, 2  ;;  %s1313_s30 = sshll.u32 %s1679_s16, 6 }
  0x38   : > { %p1845_p2 = pnand %p2089_p1, %p2088_p12  ;;  %s1854_s29 = scalar_lea.hbm %s2071_s0, %s1313_s30 }
  0x39   : > { %s164_s7 = scalar_lea.vmem [#allocation2], %s1312_s23  ;;  %s1316_s8 = sshll.u32 %s1679_s16, 4 }
  0x3a   : > { %s2090_s19 = scalar_select %p1845_p2, 1, 0 }
  0x3b   : > { %s172_s9 = sshll.u32 %s164_s7, 4  ;;  %s161_s10 = scalar_lea.sflag [#allocation3], %s1791_s28  ;;  %s1856_s9 = int_to_ptr.vmem [resolvable:$true] %s172_s9 }
  0x3c   : > { %s1537_s22 = scalar_lea.hbm %s1854_s29, 64  ;;  %s1542_s30 = scalar_lea.hbm %s2071_s0, 128 }
  0x3d   : > { %p1538_p8 = scmp.ne.s32.totalorder %s1854_s29, %s1537_s22  ;;  %p1543_p6 = scmp.lt.u32.totalorder %s1854_s29, %s2071_s0 }
  0x3e   : > { %p1544_p13 = scmp.lt.u32.totalorder %s1542_s30, %s1537_s22  ;;  %p1546_p5 = scmp.lt.u32.totalorder %s1537_s22, %s1854_s29 }
  0x3f   : > { %p1540_p9 = pnand %p1538_p8, %p1817_p4 }
  0x40   : > { %p1545_p3 = por %p1544_p13, %p1543_p6 }
  0x41   : > { %p1541_p11 = pneg %p1540_p9 }
  0x42   : > { %p1547_p7 = por %p1546_p5, %p1545_p3 }
  0x44   : > { %p1548_p10 = pnand %p1547_p7, %p1541_p11 }
  0x46   : > { %1551 = shalt.err (!%p1548_p10)
}
  0x47   : > { %s1552_s23 = scalar_lea.vmem %s1856_s9, 64  ;;  %s1686_s1 = smov [#allocation2]  }
  0x48   : > { %p1553_p12 = scmp.ne.s32.totalorder %s1856_s9, %s1552_s23  ;;  %s1557_s20 = sshll.u32 %s1686_s1, 4  ;;  %s1558_s20 = int_to_ptr.vmem [resolvable:$false] %s1557_s20 }
  0x49   : > { %s1559_s7 = scalar_lea.vmem %s1558_s20, 128  ;;  %p1560_p9 = scmp.lt.s32.totalorder %s1856_s9, %s1558_s20 }
  0x4a   : > { %p1555_p1 = pnand %p1553_p12, %p1817_p4  ;;  %p1561_p2 = scmp.lt.s32.totalorder %s1559_s7, %s1552_s23 }
  0x4c   : > { %p1556_p8 = pneg %p1555_p1  ;;  %p1562_p6 = por %p1561_p2, %p1560_p9 }
  0x4e   : > { %p1563_p13 = pnand %p1562_p6, %p1556_p8 }
  0x50   : > { %1566 = shalt.err (!%p1563_p13)
}
  0x51   : > { %1414 = dma.hbm_to_vmem [thread:$0]  (!%p1797_p0), %s1854_s29, 64, %s1856_s9, %s161_s10  }
  0x52   : > { %s1886_s5 = scalar_lea.hbm %s2073_s2, %s1316_s8  ;;  %s200_s6 = scalar_lea.vmem [#allocation7], %s1791_s28 }
  0x53   : > { %s207_s23 = sshll.u32 %s200_s6, 4  ;;  %s1567_s1 = scalar_lea.hbm %s1886_s5, 16  ;;  %s208_s23 = int_to_ptr.vmem [resolvable:$true] %s207_s23 }
  0x54   : > { %p1568_p2 = scmp.ne.s32.totalorder %s1886_s5, %s1567_s1  ;;  %s1572_s9 = scalar_lea.hbm %s2073_s2, 32 }
  0x55   : > { %p1573_p5 = scmp.lt.u32.totalorder %s1886_s5, %s2073_s2  ;;  %p1574_p7 = scmp.lt.u32.totalorder %s1572_s9, %s1567_s1 }
  0x56   : > { %p1570_p11 = pnand %p1568_p2, %p1817_p4  ;;  %p1576_p12 = scmp.lt.u32.totalorder %s1567_s1, %s1886_s5 }
  0x57   : > { %p1575_p10 = por %p1574_p7, %p1573_p5 }
  0x58   : > { %p1571_p3 = pneg %p1570_p11 }
  0x59   : > { %p1577_p1 = por %p1576_p12, %p1575_p10 }
  0x5b   : > { %p1578_p8 = pnand %p1577_p1, %p1571_p3 }
  0x5d   : > { %1581 = shalt.err (!%p1578_p8)
}
  0x5e   : > { %s1582_s28 = scalar_lea.vmem %s208_s23, 16  ;;  %s1687_s8 = smov [#allocation7]  }
  0x5f   : > { %p1583_p9 = scmp.ne.s32.totalorder %s208_s23, %s1582_s28  ;;  %s1587_s22 = sshll.u32 %s1687_s8, 4  ;;  %s1588_s22 = int_to_ptr.vmem [resolvable:$false] %s1587_s22 }
  0x60   : > { %s1589_s30 = scalar_lea.vmem %s1588_s22, 32  ;;  %p1590_p2 = scmp.lt.s32.totalorder %s208_s23, %s1588_s22 }
  0x61   : > { %p1585_p6 = pnand %p1583_p9, %p1817_p4  ;;  %p1591_p11 = scmp.lt.s32.totalorder %s1589_s30, %s1582_s28 }
  0x63   : > { %p1586_p13 = pneg %p1585_p6  ;;  %p1592_p0 = por %p1591_p11, %p1590_p2 }
  0x65   : > { %p1593_p5 = pnand %p1592_p0, %p1586_p13 }
  0x67   : > { %1596 = shalt.err (!%p1593_p5)
}
  0x68   : > { %p2091_p7 = scmp.ne.s32.totalorder %s2085_s4, 0  ;;  %p2092_p3 = scmp.ne.s32.totalorder %s2090_s19, 0 }
  0x69   : > { %s1910_s21 = sand.u32 (!%p2092_p3), 1, %s1667_s13   ;;  %p2093_p0 = scmp.ne.s32.totalorder (!%p2092_p3), %s2082_s24, 0 }
  0x6a   : > { %1420 = dma.hbm_to_vmem [thread:$0]  (!%p2091_p7), %s1886_s5, 16, %s208_s23, %s1811_s11  }
  0x6b   : > { %216 = sbr.rel (%p2092_p3) target bundleno = 1574 (0x626), region = 32  ;;  %s1318_s6 = sshll.u32 (!%p2092_p3), %s1910_s21, 2 }
  0x6c   : > { %s219_s1 = scalar_lea.sflag (!%p2092_p3), [#allocation3], %s1910_s21  ;;  %s222_s20 = scalar_lea.vmem (!%p2092_p3), [#allocation2], %s1318_s6 }
  0x72   : > { %1650 = dma.done.wait (%p2093_p0), %s219_s1, 64  }
  0x73   : > { %1652 = vsyncadd (%p2093_p0), %s219_s1, 4294967232  ;;  %s227_s4 = sand.u32 1, %s1753_s18   ;;  %s1319_s11 = sshll.u32 %s1910_s21, 3 }
  0x74   : > { %s228_s19 = scalar_lea.sflag [#allocation6], %s227_s4  ;;  %s1922_s5 = scalar_lea.vmem [#allocation5], %s1319_s11 }
  0x75   : > { %1654 = dma.done.wait (%p2093_p0), %s228_s19, 144  }
  0x76   : > { %1656 = vsyncadd (%p2093_p0), %s228_s19, 4294967152  ;;  %v273_v0 = vld [vmem:[%s222_s20] sm:$0xf]  ;;  %s1688_s23 = smov 120   ;;  %s1689_s29 = smov 104   ;;  %v1692_v9 = vmov 0.0   ;;  %v299_v28 = vlaneseq }
  0x77   : > { %283 = vrot.lane.b32.xlu0 %v273_v0, %s1688_s23  ;;  %287 = vrot.lane.b32.xlu1 %v273_v0, %s1689_s29  ;;  %v1928_v1 = vcombine.low %v273_v0, %v273_v0  ;;  %s1690_s9 = smov 112   ;;  %s1691_s10 = smov 96   ;;  %v274_v8 = vmul.bf16 1052065461, %v273_v0  ;;  %vm1693_vm0 = vmmov 0   ;;  %v289_v11 = vld [vmem:[%s1922_s5] sm:$0xff] }
  0x78   : > { %1355 = vmatprep.subr.bf16.mxu0 %v1692_v9  ;;  %1361 = vmatprep.subr.bf16.mxu1 %v1692_v9  ;;  %vm290_vm1 = vcmp.ne.s32.totalorder %v289_v11, 0  ;;  %v1694_v13 = vmov 0   ;;  %vm393_vm2 = vcmask 1043456   ;;  %vm389_vm3 = vcmask 64512   ;;  %s239_s18 = scalar_lea.vmem [#allocation7], %s1910_s21  ;;  %s1695_s24 = smov 64  }
  0x79   : > { %1357 = vmatprep.mubr.msk.bf16.mxu0 %vm1693_vm0, %v1692_v9  ;;  %1363 = vmatprep.mubr.msk.bf16.mxu1 %vm1693_vm0, %v1692_v9  ;;  %v293_v14 = vsel %vm290_vm1, 1, %v1694_v13  ;;  %v291_v29 = vld [vmem:[%s239_s18] sm:$0x1]  ;;  %v1970_v30 = vshrl.u32 %v299_v28, 7  ;;  %s1698_s7 = smov 16   ;;  %s1699_s28 = smov 8  }
  0x7a   : > { %vm292_vm4 = vcmp.ne.s32.totalorder %v291_v29, 0  ;;  %s1700_s8 = smov 24   ;;  %vm1166_vm8 = vcmask 130048   ;;  %vm1168_vm9 = vcmask 195584   ;;  %s1336_s22 = sshll.u32 %s1675_s15, 6  ;;  %vm1171_vm10 = vcmask 257024  }
  0x7b   : > { %285 = vrot.lane.b32.xlu0 %v273_v0, %s1690_s9  ;;  %313 = vrot.lane.b32.xlu1 %v1928_v1, %s1691_s10  ;;  %v301_v31 = vsub.s32 0, %v1970_v30  ;;  %v298_v32 = vsel %vm292_vm4, 1, %v1694_v13  ;;  %s270_s30 = scalar_lea.vmem [#allocation8], %s1318_s6  ;;  %s2022_s11 = scalar_lea.hbm %s2074_s3, %s1336_s22 }
  0x7c   : > { %s1188_s1 = sshll.u32 %s270_s30, 4  ;;  %s1174_s15 = scalar_lea.sflag [#allocation4], %s1910_s21  ;;  %s2024_s1 = int_to_ptr.vmem [resolvable:$true] %s1188_s1 }
  0x7d   : > { %v302_v33 = vrot.slane %v298_v32, %v301_v31  ;;  %s1597_s19 = scalar_lea.vmem %s2024_s1, 64  ;;  %p2096_p10 = scmp.ne.s32.totalorder %s2083_s25, 0 }
  0x7e   : > { %p1598_p4 = scmp.ne.s32.totalorder %s2024_s1, %s1597_s19  ;;  %s1701_s6 = smov [#allocation8]  }
  0x7f   : > { %vm303_vm5 = vcmp.eq.s32.totalorder %v302_v33, 1  ;;  %s1601_s5 = sshll.u32 %s1701_s6, 4  ;;  %s1602_s5 = int_to_ptr.vmem [resolvable:$false] %s1601_s5 }
  0x80   : > { %p1599_p12 = pnand %p1598_p4, %p2096_p10  ;;  %p1604_p8 = scmp.lt.s32.totalorder %s2024_s1, %s1602_s5 }
  0x82   : > { %p1600_p1 = pneg %p1599_p12 }
  0xe9   : > { %v284_v2 = vpop.permute.xlu0 %283  ;;  %v288_v3 = vpop.permute.xlu1 %287 }
  0xea   : > { %v1931_v4 = vcombine.low %v284_v2, %v284_v2  ;;  %v1934_v5 = vcombine.low %v288_v3, %v288_v3 }
  0xec   : > { %315 = vrot.lane.b32.xlu0 %v1931_v4, %s1691_s10 }
  0xed   : > { %v286_v6 = vpop.permute.xlu0 %285  ;;  %v314_v10 = vpop.permute.xlu1 %313 }
  0xee   : > { %v1936_v7 = vcombine.low %v286_v6, %v286_v6 }
  0xf0   : > { %319 = vrot.lane.b32.xlu0 %v1934_v5, %s1691_s10  ;;  %317 = vrot.lane.b32.xlu1 %v1936_v7, %s1691_s10 }
  0xf4   : > { %278 = vrot.lane.b32.xlu0 %v274_v8, %s1690_s9  ;;  %276 = vrot.lane.b32.xlu1 %v274_v8, %s1688_s23  ;;  %s1603_s23 = scalar_lea.vmem %s1602_s5, 128 }
  0xf5   : > { %p1605_p9 = scmp.lt.s32.totalorder %s1603_s23, %s1597_s19 }
  0xf7   : > { %p1606_p6 = por %p1605_p9, %p1604_p8 }
  0xf8   : > { %280 = vrot.lane.b32.xlu1 %v274_v8, %s1689_s29 }
  0xf9   : > { %p1607_p13 = pnand %p1606_p6, %p1600_p1 }
 0x112   : > { %325 = vxpose.xlu0.c.b16.start.end [1/1] (short) (narrow) %v314_v10, 16 }
 0x15e   : > { %v316_v12 = vpop.permute.xlu0 %315 }
 0x15f   : > { %341 = vxpose.xlu1.c.b16.start.end [1/1] (short) (narrow) %v316_v12, 16 }
 0x162   : > { %v318_v15 = vpop.permute.xlu1 %317  ;;  %v320_v16 = vpop.permute.xlu0 %319 }
 0x163   : > { %357 = vxpose.xlu0.c.b16.start.end [1/1] (short) (narrow) %v318_v15, 16  ;;  %1488 = vset.pattern.permute.xlu1 %v1694_v13 }
 0x164   : > { %295 = vperm.xlu1 %1488, %v293_v14  }
 0x166   : > { %v279_v17 = vpop.permute.xlu0 %278  ;;  %v277_v20 = vpop.permute.xlu1 %276 }
 0x167   : > { %373 = vxpose.xlu0.c.b16.start.end [1/1] (short) (narrow) %v320_v16, 16 }
 0x16a   : > { %v281_v21 = vpop.permute.xlu1 %280 }
 0x178   : > { %v333_v18 = vpop.trf.xlu0 }
 0x179   : > { %v395_v19 = vsel %vm393_vm2, %v333_v18, 0 }
 0x17a   : > { %1356 = vmatpush3.bf16.msra.mxu0 %v395_v19 }
 0x17b   : > { %1367 = vmatprep.subr.bf16.mxu0 %v1692_v9 }
 0x17d   : > { %1358 = vmatmul.mubr.msk.bf16.vlgmr.msra.gmra.mrb[0].mxu0 %vm389_vm3, %v274_v8 }
 0x17e   : > { %1369 = vmatprep.mubr.msk.bf16.mxu0 %vm1693_vm0, %v1692_v9 }
 0x1c5   : > { %v349_v22 = vpop.trf.xlu1 }
 0x1c6   : > { %v441_v23 = vsel %vm393_vm2, %v349_v22, 0 }
 0x1c7   : > { %1362 = vmatpush3.bf16.msra.mxu1 %v441_v23 }
 0x1c8   : > { %1373 = vmatprep.subr.bf16.mxu1 %v1692_v9 }
 0x1c9   : > { %v365_v24 = vpop.trf.xlu0 }
 0x1ca   : > { %v487_v25 = vsel %vm393_vm2, %v365_v24, 0  ;;  %1364 = vmatmul.mubr.msk.bf16.vlgmr.msra.gmra.mrb[0].mxu1 %vm389_vm3, %v277_v20 }
 0x1cb   : > { %1368 = vmatpush3.bf16.msra.mxu0 %v487_v25  ;;  %1375 = vmatprep.mubr.msk.bf16.mxu1 %vm1693_vm0, %v1692_v9 }
 0x1cc   : > { %1379 = vmatprep.subr.bf16.mxu0 %v1692_v9 }
 0x1cd   : > { %v381_v26 = vpop.trf.xlu0 }
 0x1ce   : > { %v533_v27 = vsel %vm393_vm2, %v381_v26, 0  ;;  %1370 = vmatmul.mubr.msk.bf16.vlgmr.msra.gmra.mrb[4].mxu0 %vm389_vm3, %v279_v17 }
 0x1cf   : > { %1374 = vmatpush3.bf16.msra.mxu1 %v533_v27  ;;  %1381 = vmatprep.mubr.msk.bf16.mxu0 %vm1693_vm0, %v1692_v9 }
 0x1d0   : > { %1385 = vmatprep.subr.bf16.mxu1 %v1692_v9 }
 0x1d2   : > { %1376 = vmatmul.mubr.msk.bf16.vlgmr.msra.gmra.mrb[4].mxu1 %vm389_vm3, %v281_v21 }
 0x1d3   : > { %1387 = vmatprep.mubr.msk.bf16.mxu1 %vm1693_vm0, %v1692_v9 }
 0x1e3   : > { %v296_v34 = vpop.permute.xlu1 %295 }
 0x1e4   : > { %vm297_vm6 = vcmp.eq.s32.totalorder %v296_v34, 1 }
 0x1e5   : > { %vm1974_vm7 = vmand %vm297_vm6, %vm303_vm5 }
 0x250   : > { %v431_v36 = vpop.f32.mrb[0].mxu0 }
 0x251   : > { %v577_v37 = vsel %vm1974_vm7, %v431_v36, -1e+09  ;;  %v1359_v38 = vpop.f32.mrb[1].mxu0 }
 0x252   : > { %v581_v39 = vsel %vm389_vm3, %v577_v37, -inf  ;;  %v434_v40 = vpop.f32.mrb[2].mxu0 }
 0x253   : > { %582 = vmax.xlane.f32.xlu0 %v581_v39  ;;  %v1360_v41 = vpop.f32.mrb[3].mxu0 }
 0x29d   : > { %v477_v42 = vpop.f32.mrb[0].mxu1 }
 0x29e   : > { %v578_v43 = vsel %vm1974_vm7, %v477_v42, -1e+09  ;;  %v1365_v44 = vpop.f32.mrb[1].mxu1 }
 0x29f   : > { %v480_v45 = vpop.f32.mrb[2].mxu1  ;;  %v584_v46 = vsel %vm389_vm3, %v578_v43, -inf }
 0x2a0   : > { %v1366_v47 = vpop.f32.mrb[3].mxu1  ;;  %585 = vmax.xlane.f32.xlu1 %v584_v46 }
 0x2a1   : > { %v523_v48 = vpop.f32.mrb[4].mxu0 }
 0x2a2   : > { %v579_v49 = vsel %vm1974_vm7, %v523_v48, -1e+09  ;;  %v1371_v50 = vpop.f32.mrb[5].mxu0 }
 0x2a3   : > { %v526_v51 = vpop.f32.mrb[6].mxu0  ;;  %v587_v52 = vsel %vm389_vm3, %v579_v49, -inf }
 0x2a4   : > { %v1372_v53 = vpop.f32.mrb[7].mxu0  ;;  %588 = vmax.xlane.f32.xlu0 %v587_v52 }
 0x2a5   : > { %v569_v54 = vpop.f32.mrb[4].mxu1 }
 0x2a6   : > { %v580_v55 = vsel %vm1974_vm7, %v569_v54, -1e+09  ;;  %v1377_v56 = vpop.f32.mrb[5].mxu1 }
 0x2a7   : > { %v572_v57 = vpop.f32.mrb[6].mxu1  ;;  %v590_v58 = vsel %vm389_vm3, %v580_v55, -inf }
 0x2a8   : > { %v1378_v59 = vpop.f32.mrb[7].mxu1  ;;  %591 = vmax.xlane.f32.xlu0 %v590_v58 }
 0x2b1   : > { %631 = vrot.lane.b32.xlu1 %v1931_v4, %s1695_s24 }
 0x2be   : > { %629 = vrot.lane.b32.xlu0 %v1928_v1, %s1695_s24 }
 0x2e0   : > { %v583_v60 = vpop.xlane.xlu0 %582 }
 0x2e1   : > { %v593_v61 = vsub.f32 %v577_v37, %v583_v60 }
 0x2e3   : > { %v597_v62 = vmul.f32 1.442695, %v593_v61 }
 0x2e5   : > { %1491 = vpow2.f32 %v597_v62 }
 0x2ef   : > { %v1492_v63 = vpop.eup %1491 }
 0x2f0   : > { %v605_v0 = vsel %vm389_vm3, %v1492_v63, 0.0 }
 0x2f1   : > { %606 = vadd.xlane.f32.xlu0 %v605_v0  ;;  %v1696_v0 = vmov 1983009808  }
 0x307   : > { %633 = vrot.lane.b32.xlu0 %v1936_v7, %s1695_s24 }
 0x32d   : > { %v586_v2 = vpop.xlane.xlu1 %585 }
 0x32e   : > { %v594_v3 = vsub.f32 %v578_v43, %v586_v2  ;;  %v1020_v2 = vunpack.c.l.s4 %v1696_v0 }
 0x330   : > { %v599_v6 = vmul.f32 1.442695, %v594_v3  ;;  %v1697_v3 = vmov 1934713408  }
 0x331   : > { %v589_v8 = vpop.xlane.xlu0 %588 }
 0x332   : > { %1493 = vpow2.f32 %v599_v6  ;;  %v595_v10 = vsub.f32 %v579_v49, %v589_v8  ;;  %v1052_v6 = vunpack.c.l.s4 %v1697_v3  ;;  %v1021_v8 = vunpack.c.0.s8 %v1020_v2 }
 0x334   : > { %v601_v11 = vmul.f32 1.442695, %v595_v10 }
 0x335   : > { %v592_v15 = vpop.xlane.xlu0 %591 }
 0x336   : > { %1495 = vpow2.f32 %v601_v11  ;;  %v596_v7 = vsub.f32 %v580_v55, %v592_v15  ;;  %v1053_v11 = vunpack.c.0.s8 %v1052_v6 }
 0x338   : > { %v603_v16 = vmul.f32 1.442695, %v596_v7  ;;  %v1056_v7 = vsub.s32 %v1053_v11, %v1970_v30 }
 0x339   : > { %v630_v17 = vpop.permute.xlu0 %629 }
 0x33a   : > { %1497 = vpow2.f32 %v603_v16 }
 0x33c   : > { %v1494_v4 = vpop.eup %1493 }
 0x33d   : > { %v608_v1 = vsel %vm389_vm3, %v1494_v4, 0.0 }
 0x33e   : > { %609 = vadd.xlane.f32.xlu1 %v608_v1 }
 0x340   : > { %v1496_v12 = vpop.eup %1495 }
 0x341   : > { %v611_v14 = vsel %vm389_vm3, %v1496_v12, 0.0 }
 0x342   : > { %612 = vadd.xlane.f32.xlu0 %v611_v14 }
 0x344   : > { %v1498_v18 = vpop.eup %1497 }
 0x345   : > { %v614_v19 = vsel %vm389_vm3, %v1498_v18, 0.0 }
 0x34f   : > { %635 = vrot.lane.b32.xlu1 %v1934_v5, %s1695_s24  ;;  %v632_v5 = vpop.permute.xlu1 %631 }
 0x36f   : > { %641 = vxpose.xlu0.c.b16.start.end [1/1] (short) (narrow) %v630_v17, 16 }
 0x373   : > { %615 = vadd.xlane.f32.xlu1 %v614_v19 }
 0x37e   : > { %v607_v20 = vpop.xlane.xlu0 %606 }
 0x37f   : > { %1499 = vrcp.f32 %v607_v20 }
 0x382   : > { %v634_v21 = vpop.permute.xlu0 %633 }
 0x383   : > { %673 = vxpose.xlu0.c.b16.start.end [1/1] (short) (narrow) %v634_v21, 16 }
 0x389   : > { %v1500_v22 = vpop.eup %1499 }
 0x38a   : > { %v621_v23 = vmul.f32 %v1500_v22, %v1492_v63 }
 0x38c   : > { %v625_v24 = vpack.c.bf16 %v621_v23, %v621_v23 }
 0x38e   : > { %v709_v25 = vsel %vm389_vm3, %v625_v24, 0 }
 0x38f   : > { %1380 = vmatpush3.bf16.xpose.msra.mxu0 %v709_v25 }
 0x390   : > { %1391 = vmatprep.subr.bf16.mxu0 %v1692_v9 }
 0x3a0   : > { %657 = vxpose.xlu1.c.b16.start.end [1/1] (short) (narrow) %v632_v5, 16 }
 0x3cb   : > { %v610_v26 = vpop.xlane.xlu1 %609 }
 0x3cc   : > { %1501 = vrcp.f32 %v610_v26 }
 0x3cf   : > { %v636_v27 = vpop.permute.xlu1 %635  ;;  %v613_v28 = vpop.xlane.xlu0 %612 }
 0x3d0   : > { %1503 = vrcp.f32 %v613_v28  ;;  %689 = vxpose.xlu0.c.b16.start.end [1/1] (short) (narrow) %v636_v27, 16 }
 0x3d5   : > { %v649_v29 = vpop.trf.xlu0 }
 0x3d6   : > { %v1502_v31 = vpop.eup %1501  ;;  %1382 = vmatmul.mubr.msk.bf16.vlgmr.msra.gmra.mrb[8].mxu0 %vm389_vm3, %v649_v29 }
 0x3d7   : > { %v622_v32 = vmul.f32 %v1502_v31, %v1494_v4  ;;  %1393 = vmatprep.mubr.msk.bf16.mxu0 %vm1693_vm0, %v1692_v9  ;;  %v1024_v4 = vsub.s32 %v1021_v8, %v1970_v30 }
 0x3d9   : > { %v626_v33 = vpack.c.bf16 %v622_v32, %v622_v32 }
 0x3da   : > { %v1504_v34 = vpop.eup %1503 }
 0x3db   : > { %v755_v35 = vsel %vm389_vm3, %v626_v33, 0  ;;  %v623_v36 = vmul.f32 %v1504_v34, %v1496_v12 }
 0x3dc   : > { %1386 = vmatpush3.bf16.xpose.msra.mxu1 %v755_v35 }
 0x3dd   : > { %v627_v37 = vpack.c.bf16 %v623_v36, %v623_v36  ;;  %1397 = vmatprep.subr.bf16.mxu1 %v1692_v9 }
 0x3df   : > { %v801_v38 = vsel %vm389_vm3, %v627_v37, 0 }
 0x3e0   : > { %1392 = vmatpush3.bf16.xpose.msra.mxu0 %v801_v38 }
 0x3e9   : > { %v681_v39 = vpop.trf.xlu0 }
 0x3ea   : > { %1394 = vmatmul.mubr.msk.bf16.vlgmr.msra.gmra.mrb[12].mxu0 %vm389_vm3, %v681_v39 }
 0x400   : > { %v616_v40 = vpop.xlane.xlu1 %615 }
 0x401   : > { %1505 = vrcp.f32 %v616_v40 }
 0x406   : > { %v665_v41 = vpop.trf.xlu1 }
 0x407   : > { %1388 = vmatmul.mubr.msk.bf16.vlgmr.msra.gmra.mrb[8].mxu1 %vm389_vm3, %v665_v41 }
 0x408   : > { %1399 = vmatprep.mubr.msk.bf16.mxu1 %vm1693_vm0, %v1692_v9 }
 0x40b   : > { %v1506_v42 = vpop.eup %1505 }
 0x40c   : > { %v624_v43 = vmul.f32 %v1506_v42, %v1498_v18 }
 0x40e   : > { %v628_v44 = vpack.c.bf16 %v624_v43, %v624_v43 }
 0x410   : > { %v847_v45 = vsel %vm389_vm3, %v628_v44, 0 }
 0x411   : > { %1398 = vmatpush3.bf16.xpose.msra.mxu1 %v847_v45 }
 0x436   : > { %v697_v46 = vpop.trf.xlu0 }
 0x437   : > { %1400 = vmatmul.mubr.msk.bf16.vlgmr.msra.gmra.mrb[12].mxu1 %vm389_vm3, %v697_v46 }
 0x4a9   : > { %v745_v47 = vpop.f32.mrb[8].mxu0 }
 0x4aa   : > { %889 = vxpose.xlu0.b32.start.end [1/1] (short) (narrow) %v745_v47, 8  ;;  %v1383_v48 = vpop.f32.mrb[9].mxu0 }
 0x4ab   : > { %v748_v49 = vpop.f32.mrb[10].mxu0 }
 0x4ac   : > { %v1384_v50 = vpop.f32.mrb[11].mxu0 }
 0x4bd   : > { %v837_v51 = vpop.f32.mrb[12].mxu0 }
 0x4be   : > { %v1395_v52 = vpop.f32.mrb[13].mxu0 }
 0x4bf   : > { %v840_v53 = vpop.f32.mrb[14].mxu0 }
 0x4c0   : > { %v1396_v54 = vpop.f32.mrb[15].mxu0 }
 0x4da   : > { %v791_v55 = vpop.f32.mrb[8].mxu1 }
 0x4db   : > { %921 = vxpose.xlu0.b32.start.end [1/1] (short) (narrow) %v791_v55, 8  ;;  %v1389_v9 = vpop.f32.mrb[9].mxu1 }
 0x4dc   : > { %v794_v56 = vpop.f32.mrb[10].mxu1 }
 0x4dd   : > { %v1390_v57 = vpop.f32.mrb[11].mxu1 }
 0x4df   : > { %953 = vxpose.xlu0.b32.start.end [1/1] (short) (narrow) %v837_v51, 8 }
 0x508   : > { %1489 = vset.pattern.permute.xlu0 %v1694_v13 }
 0x50a   : > { %v883_v58 = vpop.f32.mrb[12].mxu1 }
 0x50b   : > { %985 = vxpose.xlu1.b32.start.end [1/1] (short) (narrow) %v883_v58, 8  ;;  %v1401_v59 = vpop.f32.mrb[13].mxu1 }
 0x50c   : > { %v886_v60 = vpop.f32.mrb[14].mxu1 }
 0x50d   : > { %v1402_v61 = vpop.f32.mrb[15].mxu1 }
 0x52a   : > { %v905_v62 = vpop.trf.xlu0 }
 0x55b   : > { %v937_v63 = vpop.trf.xlu0 }
 0x55f   : > { %v969_v10 = vpop.trf.xlu0 }
 0x560   : > { %v1017_v1 = vcombine.low %v905_v62, %v969_v10  ;;  %v1018_v12 = vcombine.high %v905_v62, %v969_v10 }
 0x562   : > { %v1025_v16 = vrot.slane %v1017_v1, %v1024_v4  ;;  %v1032_v17 = vrot.slane %v1018_v12, %v1024_v4 }
 0x58b   : > { %v1001_v14 = vpop.trf.xlu1 }
 0x58c   : > { %v1033_v13 = vcombine.low %v937_v63, %v1001_v14  ;;  %v1034_v15 = vcombine.high %v937_v63, %v1001_v14 }
 0x58e   : > { %v1041_v18 = vrot.slane %v1033_v13, %v1024_v4  ;;  %v1048_v19 = vrot.slane %v1034_v15, %v1024_v4 }
 0x590   : > { %v1049_v20 = vcombine.low %v1025_v16, %v1041_v18  ;;  %v1050_v21 = vcombine.high %v1025_v16, %v1041_v18  ;;  %v1065_v22 = vcombine.low %v1032_v17, %v1048_v19  ;;  %v1066_v23 = vcombine.high %v1032_v17, %v1048_v19 }
 0x592   : > { %v1057_v24 = vrot.slane %v1049_v20, %v1056_v7  ;;  %v1064_v25 = vrot.slane %v1050_v21, %v1056_v7  ;;  %v1073_v5 = vrot.slane %v1065_v22, %v1056_v7  ;;  %v1080_v26 = vrot.slane %v1066_v23, %v1056_v7 }
 0x594   : > { %v1085_v27 = vcombine.low %v1057_v24, %v1064_v25  ;;  %v1333_v28 = vcombine.high %v1057_v24, %v1064_v25  ;;  %v1101_v29 = vcombine.low %v1073_v5, %v1080_v26  ;;  %v1334_v31 = vcombine.high %v1073_v5, %v1080_v26 }
 0x596   : > { %v1092_v32 = vrot.slane %v1085_v27, %v1024_v4  ;;  %v1100_v33 = vrot.slane %v1333_v28, %v1024_v4  ;;  %v1108_v34 = vrot.slane %v1101_v29, %v1024_v4  ;;  %v1116_v30 = vrot.slane %v1334_v31, %v1024_v4 }
 0x598   : > { %v1118_v35 = vcombine.high %v1092_v32, %v1100_v33  ;;  %v1134_v36 = vcombine.high %v1108_v34, %v1116_v30  ;;  %v1117_v37 = vcombine.low %v1092_v32, %v1100_v33  ;;  %v1133_v38 = vcombine.low %v1108_v34, %v1116_v30 }
 0x59a   : > { %v1132_v39 = vrot.slane %v1118_v35, %v1056_v7  ;;  %v1148_v40 = vrot.slane %v1134_v36, %v1056_v7  ;;  %v1125_v41 = vrot.slane %v1117_v37, %v1056_v7  ;;  %v1141_v42 = vrot.slane %v1133_v38, %v1056_v7 }
 0x59c   : > { %v1151_v43 = vcombine.low %v1132_v39, %v1148_v40  ;;  %v1150_v44 = vcombine.high %v1125_v41, %v1141_v42  ;;  %v1149_v45 = vcombine.low %v1125_v41, %v1141_v42  ;;  %v1152_v46 = vcombine.high %v1132_v39, %v1148_v40 }
 0x59e   : > { %1158 = vrot.lane.b32.xlu1 %v1151_v43, %s1698_s7  ;;  %1154 = vrot.lane.b32.xlu0 %v1150_v44, %s1699_s28 }
 0x5a2   : > { %1162 = vrot.lane.b32.xlu1 %v1152_v46, %s1700_s8 }
 0x610   : > { %v1159_v47 = vpop.permute.xlu1 %1158  ;;  %v1155_v48 = vpop.permute.xlu0 %1154 }
 0x611   : > { %v1165_v49 = vsel %vm389_vm3, %v1149_v45, %v1155_v48 }
 0x612   : > { %v1167_v51 = vsel %vm1166_vm8, %v1165_v49, %v1159_v47 }
 0x614   : > { %v1163_v50 = vpop.permute.xlu1 %1162 }
 0x615   : > { %v1169_v52 = vsel %vm1168_vm9, %v1167_v51, %v1163_v50 }
 0x616   : > { %v1170_v53 = vpack.c.bf16 %v1169_v52, %v1169_v52 }
 0x618   : > { %1172 = vst.msk [vmem:[%s270_s30] sm:$0xf] %vm1171_vm10, %v1170_v53 }
 0x619   : > { %1610 = shalt.err (!%p1607_p13)
}
 0x61a   : > { %s1611_s21 = scalar_lea.hbm %s2022_s11, 64  ;;  %s1615_s10 = scalar_lea.hbm %s2074_s3, 128 }
 0x61b   : > { %p1612_p2 = scmp.ne.s32.totalorder %s2022_s11, %s1611_s21  ;;  %p1616_p7 = scmp.lt.u32.totalorder %s2022_s11, %s2074_s3 }
 0x61c   : > { %p1617_p3 = scmp.lt.u32.totalorder %s1615_s10, %s1611_s21  ;;  %p1619_p4 = scmp.lt.u32.totalorder %s1611_s21, %s2022_s11 }
 0x61d   : > { %p1613_p11 = pnand %p1612_p2, %p2096_p10 }
 0x61e   : > { %p1618_p0 = por %p1617_p3, %p1616_p7 }
 0x61f   : > { %p1614_p5 = pneg %p1613_p11 }
 0x620   : > { %p1620_p12 = por %p1619_p4, %p1618_p0 }
 0x622   : > { %p1621_p1 = pnand %p1620_p12, %p1614_p5 }
 0x624   : > { %1624 = shalt.err (!%p1621_p1)
}
 0x625   : > { %1409 = dma.vmem_to_hbm [thread:$0]  (%p2096_p10), %s2024_s1, 64, %s2022_s11, %s1174_s15  }
 0x626 PF: > { %s1200_s7 = sand.u32 1, %s1663_s12   ;;  %p2097_p8 = scmp.ne.s32.totalorder %s2084_s27, 0 }
 0x627   : > { %p2098_p9 = scmp.ge.s32.totalorder %s1683_s17, 2  ;;  %s1201_s28 = scalar_lea.sflag [#allocation4], %s1200_s7 }
 0x629   : > { %p1422_p6 = pnand %p2098_p9, %p2097_p8 }
 0x62b   : > { %1658 = dma.done.wait (!%p1422_p6), %s1201_s28, 64  }
 0x62c   : > { %1660 = vsyncadd (!%p1422_p6), %s1201_s28, 4294967232  ;;  %s22_s17 = sadd.s32 1, %s1683_s17   ;;  %s2099_s25 = sld [smem:[#allocation12_spill]] }
 0x62d   : > { %p19_p13 = scmp.ge.s32.totalorder %s22_s17, 4   ;;  %s2100_s12 = smov %s1667_s13 }
 0x62e   : > { %s2101_s13 = smov %s1671_s14  ;;  %s2102_s14 = smov %s1782_s26 }
 0x62f   : > { %s2103_s15 = smov %s1679_s16  ;;  %21 = sbr.rel (!%p19_p13) target bundleno = 10 (0xa), region = 101 }
 0x632   : > { %s2104_s16 = smov %s2099_s25 }
 0x636   :  { %1206 = vsyncpa [#allocation3], 1 }
 0x637   :  { %1208 = vsyncpa [#allocation3 + $0x1], 1 }
 0x638   :  { %1209 = vsyncpa [#allocation6], 1 }
 0x639   :  { %1211 = vsyncpa [#allocation6 + $0x1], 1 }
 0x63a   :  { %1212 = vsyncpa [#allocation4], 1 }
 0x63b   :  { %1214 = vsyncpa [#allocation4 + $0x1], 1 }

// kernel: bert_forward.13
= control target key start
LH: loop header
LB: loop body
LE: loop exit
PB: predicated region body
PF: predicated region fallthrough
CT: control target
= control target key end

     0   :  { %12 = vsyncpa [#allocation3], 0  ;;  %s811_s0 = inlined_call_operand.hbm [shape: bf16[16,32], index: 0, kind: input, shape index: {}]   ;;  %s812_s1 = inlined_call_operand.hbm [shape: bf16[32,64], index: 1, kind: input, shape index: {}]   ;;  %s813_s2 = inlined_call_operand.hbm [shape: f32[1,64], index: 2, kind: input, shape index: {}]   ;;  %s814_s3 = inlined_call_operand.hbm [shape: bf16[64,32], index: 3, kind: input, shape index: {}]   ;;  %s815_s4 = inlined_call_operand.hbm [shape: f32[1,32], index: 4, kind: input, shape index: {}]   ;;  %s816_s5 = inlined_call_operand.hbm [shape: f32[1,32], index: 5, kind: input, shape index: {}]   ;;  %s817_s6 = inlined_call_operand.hbm [shape: f32[1,32], index: 6, kind: input, shape index: {}]   ;;  %s818_s7 = inlined_call_operand.hbm [shape: bf16[16,32], index: 7, kind: output, shape index: {}]  }
   0x1   :  { %13 = vsyncpa [#allocation6], 0 }
   0x2   :  { %14 = vsyncpa [#allocation9], 0 }
   0x3   :  { %15 = vsyncpa [#allocation12], 0 }
   0x4   :  { %16 = vsyncpa [#allocation4], 0  ;;  %s632_s24 = smov [#allocation5]   ;;  %s633_s26 = smov [#allocation8]  }
   0x5   :  { %s34_s25 = sshll.u32 %s632_s24, 4  ;;  %s56_s27 = sshll.u32 %s633_s26, 4  ;;  %s35_s25 = int_to_ptr.vmem [resolvable:$true] %s34_s25  ;;  %s684_s27 = int_to_ptr.vmem [resolvable:$true] %s56_s27 }
   0x6   :  { %s446_s30 = scalar_lea.hbm %s812_s1, 256 }
   0x7   :  { %p447_p0 = scmp.ne.s32.totalorder %s812_s1, %s446_s30  ;;  %p450_p1 = scmp.lt.u32.totalorder %s446_s30, %s812_s1 }
   0x9   :  { %p452_p2 = pnand %p450_p1, %p447_p0 }
   0xb   :  { %455 = shalt.err (!%p452_p2)
}
   0xc   :  { %s456_s12 = scalar_lea.vmem %s35_s25, 256  ;;  %p461_p4 = scmp.lt.s32.totalorder %s35_s25, %s35_s25 }
   0xd   :  { %p457_p3 = scmp.ne.s32.totalorder %s35_s25, %s456_s12  ;;  %p462_p5 = scmp.lt.s32.totalorder %s456_s12, %s456_s12 }
   0xf   :  { %p463_p6 = por %p462_p5, %p461_p4 }
  0x11   :  { %p464_p7 = pnand %p463_p6, %p457_p3 }
  0x13   :  { %467 = shalt.err (!%p464_p7)
}
  0x14   :  { %s634_s13 = smov 64   ;;  %s635_s14 = smov 4  }
  0x15   :  { %40 = dma.hbm_to_vmem [thread:$0]  %s812_s1, 256, %s35_s25, [#allocation6], %s634_s13, %s634_s13, %s635_s14  }
  0x16   :  { %s468_s19 = scalar_lea.hbm %s814_s3, 512 }
  0x17   :  { %p469_p8 = scmp.ne.s32.totalorder %s814_s3, %s468_s19  ;;  %p472_p9 = scmp.lt.u32.totalorder %s468_s19, %s814_s3 }
  0x19   :  { %p474_p10 = pnand %p472_p9, %p469_p8 }
  0x1b   :  { %477 = shalt.err (!%p474_p10)
}
  0x1c   :  { %s478_s24 = scalar_lea.vmem %s684_s27, 512  ;;  %p483_p12 = scmp.lt.s32.totalorder %s684_s27, %s684_s27 }
  0x1d   :  { %p479_p11 = scmp.ne.s32.totalorder %s684_s27, %s478_s24  ;;  %p484_p13 = scmp.lt.s32.totalorder %s478_s24, %s478_s24 }
  0x1f   :  { %p485_p0 = por %p484_p13, %p483_p12 }
  0x21   :  { %p486_p1 = pnand %p485_p0, %p479_p11 }
  0x23   :  { %489 = shalt.err (!%p486_p1)
}
  0x24   :  { %62 = dma.hbm_to_vmem [thread:$0]  %s814_s3, 512, %s684_s27, [#allocation9], %s634_s13, %s634_s13, %s635_s14  }
  0x25   :  { %s636_s26 = smov [#allocation11]   ;;  %s637_s29 = smov [#allocation2]  }
  0x26   :  { %s79_s28 = sshll.u32 %s636_s26, 4  ;;  %s22_s30 = sshll.u32 %s637_s29, 4  ;;  %s80_s28 = int_to_ptr.vmem [resolvable:$true] %s79_s28  ;;  %s721_s30 = int_to_ptr.vmem [resolvable:$true] %s22_s30 }
  0x27   :  { %s490_s10 = scalar_lea.hbm %s816_s5, 16 }
  0x28   :  { %p491_p2 = scmp.ne.s32.totalorder %s816_s5, %s490_s10  ;;  %p494_p3 = scmp.lt.u32.totalorder %s490_s10, %s816_s5 }
  0x2a   :  { %p496_p4 = pnand %p494_p3, %p491_p2 }
  0x2c   :  { %499 = shalt.err (!%p496_p4)
}
  0x2d   :  { %s500_s3 = scalar_lea.vmem %s80_s28, 16  ;;  %s504_s27 = scalar_lea.vmem %s80_s28, 32 }
  0x2e   :  { %p501_p5 = scmp.ne.s32.totalorder %s80_s28, %s500_s3  ;;  %p505_p6 = scmp.lt.s32.totalorder %s80_s28, %s80_s28 }
  0x2f   :  { %p506_p7 = scmp.lt.s32.totalorder %s504_s27, %s500_s3 }
  0x31   :  { %p507_p8 = por %p506_p7, %p505_p6 }
  0x33   :  { %p508_p9 = pnand %p507_p8, %p501_p5 }
  0x35   :  { %511 = shalt.err (!%p508_p9)
}
  0x36   :  { %82 = dma.hbm_to_vmem [thread:$0]  %s816_s5, 16, %s80_s28, [#allocation12]  }
  0x37   :  { %s512_s21 = scalar_lea.hbm %s811_s0, 128 }
  0x38   :  { %p513_p10 = scmp.ne.s32.totalorder %s811_s0, %s512_s21  ;;  %p516_p11 = scmp.lt.u32.totalorder %s512_s21, %s811_s0 }
  0x3a   :  { %p518_p12 = pnand %p516_p11, %p513_p10 }
  0x3c   :  { %521 = shalt.err (!%p518_p12)
}
  0x3d   :  { %s522_s25 = scalar_lea.vmem %s721_s30, 128  ;;  %p527_p0 = scmp.lt.s32.totalorder %s721_s30, %s721_s30 }
  0x3e   :  { %p523_p13 = scmp.ne.s32.totalorder %s721_s30, %s522_s25  ;;  %p528_p1 = scmp.lt.s32.totalorder %s522_s25, %s522_s25 }
  0x40   :  { %p529_p2 = por %p528_p1, %p527_p0 }
  0x42   :  { %p530_p3 = pnand %p529_p2, %p523_p13 }
  0x44   :  { %533 = shalt.err (!%p530_p3)
}
  0x45   :  { %28 = dma.hbm_to_vmem [thread:$0]  %s811_s0, 128, %s721_s30, [#allocation3], %s634_s13, %s634_s13, %s635_s14  }
  0x46   :  { %s638_s28 = smov [#allocation7]   ;;  %s639_s8 = smov [#allocation10]  }
  0x47   :  { %s47_s29 = sshll.u32 %s638_s28, 4  ;;  %s69_s9 = sshll.u32 %s639_s8, 4  ;;  %s48_s29 = int_to_ptr.vmem [resolvable:$true] %s47_s29  ;;  %s70_s9 = int_to_ptr.vmem [resolvable:$true] %s69_s9 }
  0x48   :  { %s534_s12 = scalar_lea.hbm %s813_s2, 16 }
  0x49   :  { %p535_p4 = scmp.ne.s32.totalorder %s813_s2, %s534_s12  ;;  %p538_p5 = scmp.lt.u32.totalorder %s534_s12, %s813_s2 }
  0x4b   :  { %p540_p6 = pnand %p538_p5, %p535_p4 }
  0x4d   :  { %543 = shalt.err (!%p540_p6)
}
  0x4e   :  { %s544_s0 = scalar_lea.vmem %s48_s29, 16  ;;  %s548_s30 = scalar_lea.vmem %s48_s29, 32 }
  0x4f   :  { %p545_p7 = scmp.ne.s32.totalorder %s48_s29, %s544_s0  ;;  %p549_p8 = scmp.lt.s32.totalorder %s48_s29, %s48_s29 }
  0x50   :  { %p550_p9 = scmp.lt.s32.totalorder %s548_s30, %s544_s0 }
  0x52   :  { %p551_p10 = por %p550_p9, %p549_p8 }
  0x54   :  { %p552_p11 = pnand %p551_p10, %p545_p7 }
  0x56   :  { %555 = shalt.err (!%p552_p11)
}
  0x57   :  { %50 = dma.hbm_to_vmem [thread:$0]  %s813_s2, 16, %s48_s29, [#allocation6]  }
  0x58   :  { %s556_s21 = scalar_lea.hbm %s815_s4, 16 }
  0x59   :  { %p557_p12 = scmp.ne.s32.totalorder %s815_s4, %s556_s21  ;;  %p560_p13 = scmp.lt.u32.totalorder %s556_s21, %s815_s4 }
  0x5b   :  { %p562_p0 = pnand %p560_p13, %p557_p12 }
  0x5d   :  { %565 = shalt.err (!%p562_p0)
}
  0x5e   :  { %s566_s25 = scalar_lea.vmem %s70_s9, 16  ;;  %s570_s5 = scalar_lea.vmem %s70_s9, 32 }
  0x5f   :  { %p567_p1 = scmp.ne.s32.totalorder %s70_s9, %s566_s25  ;;  %p571_p2 = scmp.lt.s32.totalorder %s70_s9, %s70_s9 }
  0x60   :  { %p572_p3 = scmp.lt.s32.totalorder %s570_s5, %s566_s25 }
  0x62   :  { %p573_p4 = por %p572_p3, %p571_p2 }
  0x64   :  { %p574_p5 = pnand %p573_p4, %p567_p1 }
  0x66   :  { %577 = shalt.err (!%p574_p5)
}
  0x67   :  { %72 = dma.hbm_to_vmem [thread:$0]  %s815_s4, 16, %s70_s9, [#allocation9]  }
  0x68   :  { %s640_s28 = smov [#allocation13]   ;;  %s578_s11 = scalar_lea.hbm %s817_s6, 16 }
  0x69   :  { %s89_s29 = sshll.u32 %s640_s28, 4  ;;  %p579_p6 = scmp.ne.s32.totalorder %s817_s6, %s578_s11  ;;  %s90_s29 = int_to_ptr.vmem [resolvable:$true] %s89_s29 }
  0x6a   :  { %p582_p7 = scmp.lt.u32.totalorder %s578_s11, %s817_s6 }
  0x6c   :  { %p584_p8 = pnand %p582_p7, %p579_p6 }
  0x6e   :  { %587 = shalt.err (!%p584_p8)
}
  0x6f   :  { %s588_s27 = scalar_lea.vmem %s90_s29, 16  ;;  %s592_s4 = scalar_lea.vmem %s90_s29, 32 }
  0x70   :  { %p589_p9 = scmp.ne.s32.totalorder %s90_s29, %s588_s27  ;;  %p593_p10 = scmp.lt.s32.totalorder %s90_s29, %s90_s29 }
  0x71   :  { %p594_p11 = scmp.lt.s32.totalorder %s592_s4, %s588_s27 }
  0x73   :  { %p595_p12 = por %p594_p11, %p593_p10 }
  0x75   :  { %p596_p13 = pnand %p595_p12, %p589_p9 }
  0x77   :  { %599 = shalt.err (!%p596_p13)
}
  0x78   :  { %92 = dma.hbm_to_vmem [thread:$0]  %s817_s6, 16, %s90_s29, [#allocation12]  }
  0x79   :  { %622 = dma.done.wait [#allocation3], 128  }
  0x7a   :  { %623 = vsyncadd [#allocation3], 4294967168 }
  0x7b   :  { %624 = dma.done.wait [#allocation6], 272  }
  0x7c   :  { %625 = vsyncadd [#allocation6], 4294967024 }
  0x7d   :  { %626 = dma.done.wait [#allocation9], 528  }
  0x7e   :  { %627 = vsyncadd [#allocation9], 4294966768 }
  0x7f   :  { %628 = dma.done.wait [#allocation12], 32  }
  0x80   :  { %629 = vsyncadd [#allocation12], 4294967264  ;;  %v641_v0 = vmov 0.0   ;;  %vm642_vm0 = vmmov 0   ;;  %v430_v1 = vld [vmem:[#allocation5] sm:$0xff]   ;;  %v431_v2 = vld [vmem:[#allocation5 + $0x8] sm:$0xff]  }
  0x81   :  { %398 = vmatprep.subr.bf16.mxu0 %v641_v0  ;;  %402 = vmatprep.mubr.msk.bf16.mxu0 %vm642_vm0, %v641_v0  ;;  %v115_v3 = vld [vmem:[#allocation2] sm:$0xff]   ;;  %vm145_vm1 = vcmask 261120   ;;  %v435_v6 = vld [vmem:[#allocation8 + $0x10] sm:$0xff]   ;;  %v436_v7 = vld [vmem:[#allocation8 + $0x18] sm:$0xff]   ;;  %vm248_vm2 = vcmask 523264   ;;  %vm350_vm3 = vcmask 257024  }
  0x82   :  { %406 = vmatprep.subr.bf16.mxu1 %v641_v0  ;;  %414 = vmatprep.mubr.msk.bf16.mxu1 %vm642_vm0, %v641_v0  ;;  %v433_v4 = vld [vmem:[#allocation8] sm:$0xff]   ;;  %v434_v5 = vld [vmem:[#allocation8 + $0x8] sm:$0xff]   ;;  %v373_v8 = vld [vmem:[#allocation7] ss:$0 sm:$0xff]  ;;  %v293_v35 = vunpack.c.l.bf16 %v115_v3  ;;  %v294_v39 = vunpack.c.h.bf16 %v115_v3  ;;  %s643_s6 = smov [#allocation14]  }
  0x83   :  { %399 = vmatpush3.bf16.msra.mxu0 %v430_v1  ;;  %407 = vmatpush3.bf16.msra.mxu1 %v433_v4  ;;  %v378_v34 = vld [vmem:[#allocation10] ss:$0 sm:$0xff]  ;;  %s358_s30 = sshll.u32 %s643_s6, 4  ;;  %s359_s30 = int_to_ptr.vmem [resolvable:$true] %s358_s30 }
  0x84   :  { %400 = vmatprep.subr.bf16.mxu0 %v641_v0  ;;  %408 = vmatprep.subr.bf16.mxu1 %v641_v0  ;;  %s600_s17 = scalar_lea.vmem %s359_s30, 128  ;;  %p605_p1 = scmp.lt.s32.totalorder %s359_s30, %s359_s30 }
  0x85   :  { %p601_p0 = scmp.ne.s32.totalorder %s359_s30, %s600_s17  ;;  %p606_p2 = scmp.lt.s32.totalorder %s600_s17, %s600_s17 }
  0x87   :  { %401 = vmatpush3.bf16.msra.mxu0 %v431_v2  ;;  %409 = vmatpush3.bf16.msra.mxu1 %v434_v5  ;;  %v385_v2 = vld [vmem:[#allocation13] ss:$0 sm:$0xff]  ;;  %p607_p3 = por %p606_p2, %p605_p1 }
  0x88   :  { %410 = vmatprep.subr.bf16.mxu1 %v641_v0 }
  0x89   :  { %p608_p4 = pnand %p607_p3, %p601_p0 }
  0x8a   :  { %403 = vmatmul.mubr.msk.bf16.vlgmr.msra.gmra.mrb[0].mxu0 %vm145_vm1, %v115_v3 }
  0x8b   :  { %411 = vmatpush3.bf16.msra.mxu1 %v435_v6 }
  0x8c   :  { %412 = vmatprep.subr.bf16.mxu1 %v641_v0  ;;  %v384_v0 = vld [vmem:[#allocation11] ss:$0 sm:$0xff] }
  0x8f   :  { %413 = vmatpush3.bf16.msra.mxu1 %v436_v7 }
 0x15d   :  { %v183_v9 = vpop.f32.mrb[0].mxu0 }
 0x15e   :  { %v184_v10 = vadd.f32 %v373_v8, %v183_v9  ;;  %v404_v11 = vpop.f32.mrb[1].mxu0 }
 0x15f   :  { %v186_v12 = vpop.f32.mrb[2].mxu0 }
 0x160   :  { %v190_v13 = vmul.f32 %v184_v10, %v184_v10  ;;  %v187_v14 = vadd.f32 %v373_v8, %v186_v12  ;;  %v405_v15 = vpop.f32.mrb[3].mxu0 }
 0x162   :  { %v192_v16 = vmul.f32 %v190_v13, %v184_v10  ;;  %v191_v17 = vmul.f32 %v187_v14, %v187_v14 }
 0x164   :  { %v194_v18 = vmul.f32 0.044715, %v192_v16  ;;  %v193_v19 = vmul.f32 %v191_v17, %v187_v14 }
 0x166   :  { %v196_v20 = vadd.f32 %v194_v18, %v184_v10  ;;  %v195_v21 = vmul.f32 0.044715, %v193_v19 }
 0x168   :  { %v198_v22 = vmul.f32 0.7978846, %v196_v20  ;;  %v197_v23 = vadd.f32 %v195_v21, %v187_v14 }
 0x16a   :  { %438 = vtanh.f32 %v198_v22  ;;  %v199_v24 = vmul.f32 0.7978846, %v197_v23 }
 0x16c   :  { %440 = vtanh.f32 %v199_v24 }
 0x174   :  { %v439_v25 = vpop.eup %438 }
 0x175   :  { %v202_v26 = vadd.f32 1.0, %v439_v25 }
 0x176   :  { %v441_v27 = vpop.eup %440 }
 0x177   :  { %v204_v28 = vmul.f32 0.5, %v202_v26  ;;  %v203_v29 = vadd.f32 1.0, %v441_v27 }
 0x179   :  { %v205_v30 = vmul.f32 0.5, %v203_v29  ;;  %v206_v31 = vmul.f32 %v204_v28, %v184_v10 }
 0x17b   :  { %v207_v32 = vmul.f32 %v205_v30, %v187_v14 }
 0x17d   :  { %v208_v33 = vpack.c.bf16 %v207_v32, %v206_v31 }
 0x17f   :  { %415 = vmatmul.mubr.msk.bf16.vlgmr.msra.gmra.mrb[0].mxu1 %vm248_vm2, %v208_v33 }
 0x252   :  { %v286_v36 = vpop.f32.mrb[0].mxu1 }
 0x253   :  { %v287_v37 = vadd.f32 %v378_v34, %v286_v36  ;;  %v416_v38 = vpop.f32.mrb[1].mxu1 }
 0x254   :  { %v289_v40 = vpop.f32.mrb[2].mxu1 }
 0x255   :  { %v290_v41 = vadd.f32 %v378_v34, %v289_v40  ;;  %v417_v42 = vpop.f32.mrb[3].mxu1  ;;  %v295_v43 = vadd.f32 %v293_v35, %v287_v37 }
 0x257   :  { %v297_v44 = vsel %vm145_vm1, %v295_v43, 0.0  ;;  %v296_v45 = vadd.f32 %v294_v39, %v290_v41 }
 0x258   :  { %298 = vadd.xlane.f32.xlu0 %v297_v44 }
 0x259   :  { %v300_v46 = vsel %vm145_vm1, %v296_v45, 0.0 }
 0x25c   :  { %301 = vadd.xlane.f32.xlu0 %v300_v46 }
 0x2e5   :  { %v299_v47 = vpop.xlane.xlu0 %298 }
 0x2e6   :  { %v304_v48 = vmul.f32 0.03125, %v299_v47 }
 0x2e8   :  { %v306_v49 = vsub.f32 %v295_v43, %v304_v48 }
 0x2e9   :  { %v302_v50 = vpop.xlane.xlu0 %301 }
 0x2ea   :  { %v305_v51 = vmul.f32 0.03125, %v302_v50  ;;  %v308_v52 = vmul.f32 %v306_v49, %v306_v49 }
 0x2ec   :  { %v307_v53 = vsub.f32 %v296_v45, %v305_v51  ;;  %v310_v54 = vsel %vm145_vm1, %v308_v52, 0.0 }
 0x2ed   :  { %311 = vadd.xlane.f32.xlu1 %v310_v54 }
 0x2ee   :  { %v309_v55 = vmul.f32 %v307_v53, %v307_v53 }
 0x2f0   :  { %v313_v56 = vsel %vm145_vm1, %v309_v55, 0.0 }
 0x2f1   :  { %314 = vadd.xlane.f32.xlu1 %v313_v56 }
 0x37a   :  { %v312_v57 = vpop.xlane.xlu1 %311 }
 0x37b   :  { %v316_v58 = vmul.f32 0.03125, %v312_v57 }
 0x37d   :  { %v318_v59 = vadd.f32 1e-06, %v316_v58 }
 0x37e   :  { %v315_v60 = vpop.xlane.xlu1 %314 }
 0x37f   :  { %442 = vrsqrt.f32 %v318_v59  ;;  %v317_v61 = vmul.f32 0.03125, %v315_v60 }
 0x381   :  { %v319_v62 = vadd.f32 1e-06, %v317_v61 }
 0x383   :  { %444 = vrsqrt.f32 %v319_v62 }
 0x389   :  { %v443_v63 = vpop.eup %442 }
 0x38a   :  { %v322_v1 = vmul.f32 %v443_v63, %v306_v49 }
 0x38c   :  { %v331_v3 = vmul.f32 %v384_v0, %v322_v1 }
 0x38d   :  { %v445_v4 = vpop.eup %444 }
 0x38e   :  { %v323_v5 = vmul.f32 %v445_v4, %v307_v53  ;;  %v340_v6 = vadd.f32 %v385_v2, %v331_v3 }
 0x390   :  { %v332_v7 = vmul.f32 %v384_v0, %v323_v5  ;;  %v388_v8 = vpack.c.bf16 %v340_v6, %v340_v6 }
 0x392   :  { %v341_v9 = vadd.f32 %v385_v2, %v332_v7  ;;  %351 = vst.msk [vmem:[#allocation14] sm:$0xf] %vm350_vm3, %v388_v8 }
 0x394   :  { %v389_v10 = vpack.c.bf16 %v341_v9, %v341_v9 }
 0x396   :  { %352 = vst.msk [vmem:[#allocation14 + $0x4] sm:$0xf] %vm350_vm3, %v389_v10 }
 0x397   :  { %611 = shalt.err (!%p608_p4)
}
 0x398   :  { %s612_s20 = scalar_lea.hbm %s818_s7, 128 }
 0x399   :  { %p613_p5 = scmp.ne.s32.totalorder %s818_s7, %s612_s20  ;;  %p616_p6 = scmp.lt.u32.totalorder %s612_s20, %s818_s7 }
 0x39b   :  { %p618_p7 = pnand %p616_p6, %p613_p5 }
 0x39d   :  { %621 = shalt.err (!%p618_p7)
}
 0x39e   :  { %364 = dma.vmem_to_hbm [thread:$0]  %s359_s30, 128, %s818_s7, [#allocation4], %s634_s13, %s634_s13, %s635_s14  }
 0x39f   :  { %630 = dma.done.wait [#allocation4], 128  }
 0x3a0   :  { %631 = vsyncadd [#allocation4], 4294967168 }
 0x3a1   :  { %368 = vsyncpa [#allocation3], 1 }
 0x3a2   :  { %369 = vsyncpa [#allocation6], 1 }
 0x3a3   :  { %370 = vsyncpa [#allocation9], 1 }
 0x3a4   :  { %371 = vsyncpa [#allocation12], 1 }
 0x3a5   :  { %372 = vsyncpa [#allocation4], 1 }

</bundles_post_ra>
